<compile_context>
chip_gen: v7x
topology: tpu7x:2x2x1
jax: 0.10.0
libtpu: 0.0.40
codegen_flags: <defaults>
</compile_context>

<pallas_src>
import jax
import jax.numpy as jnp
from jax.experimental import pallas as pl
from jax.experimental.pallas import tpu as pltpu

IN_FEATURES = 2048     # self.in_features
HIDDEN = 1024          # self.fc out features
NUM_CLASSES = 4        # cls_head out features
N_SPLIT = 2            # split HIDDEN across the grid (2 steps / 2 TCs on v7x)
HALF = HIDDEN // N_SPLIT

_VMEM_LIMIT = 16 * 1024 * 1024


def _head_kernel_acc(x_ref, w1_ref, b1_ref, w2_ref, bcls_ref, o_ref):
    """One HIDDEN-half of fc -> relu -> cls_head, accumulated into o_ref.

    x_ref    : (B, IN_FEATURES)      bf16  backbone features
    w1_ref   : (IN_FEATURES, HALF)   bf16  fc weight column-half
    b1_ref   : (1, HALF)             f32   fc bias half
    w2_ref   : (HALF, NUM_CLASSES)   bf16  cls_head weight row-half
    bcls_ref : (1, NUM_CLASSES)      f32   cls_head bias
    o_ref    : (B, NUM_CLASSES)      f32   logits (resident accumulator block)
    """
    j = pl.program_id(0)
    # fc half: bf16 x bf16 -> f32 accumulation on the MXU (full K in one shot).
    h = jnp.dot(x_ref[...], w1_ref[...], preferred_element_type=jnp.float32)
    h = jnp.maximum(h + b1_ref[...], 0.0)          # fc bias + F.relu
    # F.dropout(p=0.5, training=False) -> identity at inference.
    partial = jnp.dot(h.astype(jnp.bfloat16), w2_ref[...],
                      preferred_element_type=jnp.float32)

    @pl.when(j == 0)
    def _():
        o_ref[...] = jnp.zeros_like(o_ref)

    o_ref[...] += partial

    @pl.when(j == pl.num_programs(0) - 1)
    def _():
        o_ref[...] += bcls_ref[...]


def _head_kernel_partial(x_ref, w1_ref, b1_ref, w2_ref, o_ref):
    """Per-half partial logits (one HIDDEN-half per TensorCore on v7x)."""
    h = jnp.dot(x_ref[...], w1_ref[...], preferred_element_type=jnp.float32)
    h = jnp.maximum(h + b1_ref[...], 0.0)
    o_ref[...] = jnp.dot(h.astype(jnp.bfloat16), w2_ref[...],
                         preferred_element_type=jnp.float32)[None]


def _head_singlecore(feats, w_fc, b_fc, w_cls, b_cls):
    """Default path (v5e/v6e): arbitrary split axis, in-kernel reduce + bias."""
    B = feats.shape[0]
    return pl.pallas_call(
        _head_kernel_acc,
        out_shape=jax.ShapeDtypeStruct((B, NUM_CLASSES), jnp.float32),
        grid_spec=pltpu.PrefetchScalarGridSpec(
            num_scalar_prefetch=0,
            grid=(N_SPLIT,),
            in_specs=[
                # feats: same full block for both halves (64 KB, negligible).
                pl.BlockSpec((B, IN_FEATURES), lambda j: (0, 0)),
                # fc weight: half of the output columns per step (2 MiB bf16).
                pl.BlockSpec((IN_FEATURES, HALF), lambda j: (0, j)),
                # fc bias half.
                pl.BlockSpec((1, HALF), lambda j: (0, j)),
                # cls_head weight rows matching this HIDDEN half.
                pl.BlockSpec((HALF, NUM_CLASSES), lambda j: (j, 0)),
                # cls bias (added on the last step only).
                pl.BlockSpec((1, NUM_CLASSES), lambda j: (0, 0)),
            ],
            # Same output block for every step -> resident accumulator.
            out_specs=pl.BlockSpec((B, NUM_CLASSES), lambda j: (0, 0)),
        ),
        compiler_params=pltpu.CompilerParams(
            dimension_semantics=("arbitrary",),
            vmem_limit_bytes=_VMEM_LIMIT,
        ),
    )(feats, w_fc, b_fc, w_cls, b_cls)


def _head_multicore(feats, w_fc, b_fc, w_cls, b_cls):
    """v7x path: one HIDDEN half per TensorCore, partials summed in wrapper."""
    B = feats.shape[0]
    partials = pl.pallas_call(
        _head_kernel_partial,
        out_shape=jax.ShapeDtypeStruct((N_SPLIT, B, NUM_CLASSES), jnp.float32),
        grid_spec=pltpu.PrefetchScalarGridSpec(
            num_scalar_prefetch=0,
            grid=(N_SPLIT,),
            in_specs=[
                pl.BlockSpec((B, IN_FEATURES), lambda j: (0, 0)),
                pl.BlockSpec((IN_FEATURES, HALF), lambda j: (0, j)),
                pl.BlockSpec((1, HALF), lambda j: (0, j)),
                pl.BlockSpec((HALF, NUM_CLASSES), lambda j: (j, 0)),
            ],
            out_specs=pl.BlockSpec((1, B, NUM_CLASSES), lambda j: (j, 0, 0)),
        ),
        compiler_params=pltpu.CompilerParams(
            dimension_semantics=(pltpu.CORE_PARALLEL,),
            vmem_limit_bytes=_VMEM_LIMIT,
        ),
    )(feats, w_fc, b_fc, w_cls)
    # Trivial [2, B, 4] reduction + bias.
    return partials.sum(axis=0) + b_cls


def _has_multiple_tensorcores():
    """True on v7x-class chips (2 TensorCores/chip); perf heuristic only."""
    try:
        kind = jax.devices()[0].device_kind.lower()
    except Exception:
        return False
    return ("v7" in kind) or ("7x" in kind)


def prepare_params(w_fc, b_fc, w_cls, b_cls):
    """One-time cast/reshape at weight-load time (hoisted out of the hot path)."""
    return (
        w_fc.astype(jnp.bfloat16),                        # (IN_FEATURES, HIDDEN)
        b_fc.reshape(1, HIDDEN).astype(jnp.float32),      # (1, HIDDEN)
        w_cls.astype(jnp.bfloat16),                       # (HIDDEN, NUM_CLASSES)
        b_cls.reshape(1, NUM_CLASSES).astype(jnp.float32),
    )


def pretrain_model_head(feats, prepared_params):
    """Head of PretrainModel.forward (eval mode) on backbone features.

    feats: [B, IN_FEATURES] backbone output (already x.view(-1, in_features)).
    prepared_params: output of prepare_params().
    """
    feats = feats.reshape(-1, IN_FEATURES).astype(jnp.bfloat16)
    w_fc, b_fc, w_cls, b_cls = prepared_params
    if _has_multiple_tensorcores():
        try:
            out = _head_multicore(feats, w_fc, b_fc, w_cls, b_cls)
            return jax.block_until_ready(out)
        except Exception:
            pass  # fall back to the single-TC accumulator path
    return _head_singlecore(feats, w_fc, b_fc, w_cls, b_cls)


def _xavier_uniform(key, fan_in, fan_out, shape):
    bound = (6.0 / (fan_in + fan_out)) ** 0.5
    return jax.random.uniform(key, shape, jnp.float32, -bound, bound)


def init_params(key):
    """Deterministic parameter init mirroring initialize_head (xavier + zero bias)."""
    k1, k2 = jax.random.split(key)
    # Stored as (in, out) so the kernel computes feats @ W  (== x @ W_torch.T).
    w_fc = _xavier_uniform(k1, IN_FEATURES, HIDDEN, (IN_FEATURES, HIDDEN))
    b_fc = jnp.zeros((HIDDEN,), jnp.float32)
    w_cls = _xavier_uniform(k2, HIDDEN, NUM_CLASSES, (HIDDEN, NUM_CLASSES))
    b_cls = jnp.zeros((NUM_CLASSES,), jnp.float32)
    return w_fc, b_fc, w_cls, b_cls


def reference_head(feats, w_fc, b_fc, w_cls, b_cls):
    """Pure-JAX reference of the module's head (eval mode, autocast-style bf16)."""
    x = feats.reshape(-1, IN_FEATURES)
    h = jnp.dot(x.astype(jnp.bfloat16), w_fc.astype(jnp.bfloat16),
                preferred_element_type=jnp.float32)
    h = jnp.maximum(h + b_fc, 0.0)
    logits = jnp.dot(h.astype(jnp.bfloat16), w_cls.astype(jnp.bfloat16),
                     preferred_element_type=jnp.float32)
    return logits + b_cls


if __name__ == "__main__":
    key = jax.random.PRNGKey(0)
    k_feat, k_param = jax.random.split(key)

    B = 16  # fills one bf16 (16, 128) sublane tile
    # Backbone features standing in for self.backbone(x) with x NCHW images.
    feats = jax.random.normal(k_feat, (B, IN_FEATURES), jnp.float32)

    raw_params = init_params(k_param)
    prepared = prepare_params(*raw_params)   # once, at weight-load time

    out = pretrain_model_head(feats, prepared)
    out = jax.block_until_ready(out)

    ref = reference_head(feats, *raw_params)
    assert out.shape == (B, NUM_CLASSES), out.shape
    max_err = float(jnp.max(jnp.abs(out - ref)))
    assert jnp.allclose(out, ref, atol=2e-3, rtol=2e-3), max_err
    print("KERNEL_OK")
</pallas_src>

<mosaic_0001>
module attributes {stable_mosaic.version = 11 : i64} {
  func.func @_head_kernel_acc(%arg0: i32, %arg1: memref<16x2048xbf16, #tpu.memory_space<vmem>>, %arg2: memref<2048x512xbf16, #tpu.memory_space<vmem>>, %arg3: memref<1x512xf32, #tpu.memory_space<vmem>>, %arg4: memref<512x4xbf16, #tpu.memory_space<vmem>>, %arg5: memref<1x4xf32, #tpu.memory_space<vmem>>, %arg6: memref<16x4xf32, #tpu.memory_space<vmem>>) attributes {dimension_semantics = [#tpu.dimension_semantics<arbitrary>], iteration_bounds = array<i64: 2>, scalar_prefetch = 0 : i64, scratch_operands = 0 : i64, tpu.core_type = #tpu.core_type<tc>, window_params = [{pipeline_mode = #tpu.pipeline_mode<synchronous>, transform_indices = @transform_0, window_bounds = array<i64: 16, 2048>}, {transform_indices = @transform_1, window_bounds = array<i64: 2048, 512>}, {transform_indices = @transform_2, window_bounds = array<i64: 1, 512>}, {transform_indices = @transform_3, window_bounds = array<i64: 512, 4>}, {pipeline_mode = #tpu.pipeline_mode<synchronous>, transform_indices = @transform_4, window_bounds = array<i64: 1, 4>}, {pipeline_mode = #tpu.pipeline_mode<synchronous>, transform_indices = @transform_5, window_bounds = array<i64: 16, 4>}]} {
    %c0 = arith.constant 0 : index
    %c0_0 = arith.constant 0 : index
    %0 = vector.load %arg1[%c0, %c0_0] : memref<16x2048xbf16, #tpu.memory_space<vmem>>, vector<16x2048xbf16>
    %c0_1 = arith.constant 0 : index
    %c0_2 = arith.constant 0 : index
    %1 = vector.load %arg2[%c0_1, %c0_2] : memref<2048x512xbf16, #tpu.memory_space<vmem>>, vector<2048x512xbf16>
    %cst = arith.constant dense<0.000000e+00> : vector<16x512xf32>
    %2 = tpu.matmul %0, %1, %cst {dimension_numbers = #tpu.dot_dimension_numbers<[1], [0], [0], [1], [0, 0, 1, 1], [], []>} : vector<16x2048xbf16>, vector<2048x512xbf16>, vector<16x512xf32> -> vector<16x512xf32>
    %c0_3 = arith.constant 0 : index
    %c0_4 = arith.constant 0 : index
    %3 = vector.load %arg3[%c0_3, %c0_4] : memref<1x512xf32, #tpu.memory_space<vmem>>, vector<1x512xf32>
    %4 = vector.broadcast %3 : vector<1x512xf32> to vector<16x512xf32>
    %5 = arith.addf %2, %4 : vector<16x512xf32>
    %cst_5 = arith.constant 0.000000e+00 : f32
    %6 = vector.broadcast %cst_5 : f32 to vector<16x512xf32>
    %7 = arith.maximumf %5, %6 : vector<16x512xf32>
    %8 = arith.truncf %7 : vector<16x512xf32> to vector<16x512xbf16>
    %c0_6 = arith.constant 0 : index
    %c0_7 = arith.constant 0 : index
    %9 = vector.load %arg4[%c0_6, %c0_7] : memref<512x4xbf16, #tpu.memory_space<vmem>>, vector<512x4xbf16>
    %cst_8 = arith.constant dense<0.000000e+00> : vector<16x4xf32>
    %10 = tpu.matmul %8, %9, %cst_8 {dimension_numbers = #tpu.dot_dimension_numbers<[1], [0], [0], [1], [0, 0, 1, 1], [], []>} : vector<16x512xbf16>, vector<512x4xbf16>, vector<16x4xf32> -> vector<16x4xf32>
    %c0_i32 = arith.constant 0 : i32
    %11 = arith.cmpi eq, %arg0, %c0_i32 : i32
    %12 = arith.extui %11 : i1 to i32
    %c0_i32_9 = arith.constant 0 : i32
    %13 = arith.cmpi ne, %12, %c0_i32_9 : i32
    scf.if %13 {
      %cst_15 = arith.constant 0.000000e+00 : f32
      %20 = vector.broadcast %cst_15 : f32 to vector<16x4xf32>
      %c0_16 = arith.constant 0 : index
      %c0_17 = arith.constant 0 : index
      %21 = vector.load %arg6[%c0_16, %c0_17] : memref<16x4xf32, #tpu.memory_space<vmem>>, vector<16x4xf32>
      tpu.vector_store %arg6[%c0_16, %c0_17], %20 {strides = array<i32>} : memref<16x4xf32, #tpu.memory_space<vmem>>, vector<16x4xf32>,
    } else {
    }
    %c0_10 = arith.constant 0 : index
    %c0_11 = arith.constant 0 : index
    %14 = vector.load %arg6[%c0_10, %c0_11] : memref<16x4xf32, #tpu.memory_space<vmem>>, vector<16x4xf32>
    %15 = arith.addf %14, %10 : vector<16x4xf32>
    %c0_12 = arith.constant 0 : index
    %c0_13 = arith.constant 0 : index
    %16 = vector.load %arg6[%c0_12, %c0_13] : memref<16x4xf32, #tpu.memory_space<vmem>>, vector<16x4xf32>
    tpu.vector_store %arg6[%c0_12, %c0_13], %15 {strides = array<i32>} : memref<16x4xf32, #tpu.memory_space<vmem>>, vector<16x4xf32>,
    %c1_i32 = arith.constant 1 : i32
    %17 = arith.cmpi eq, %arg0, %c1_i32 : i32
    %18 = arith.extui %17 : i1 to i32
    %c0_i32_14 = arith.constant 0 : i32
    %19 = arith.cmpi ne, %18, %c0_i32_14 : i32
    scf.if %19 {
      %c0_15 = arith.constant 0 : index
      %c0_16 = arith.constant 0 : index
      %20 = vector.load %arg6[%c0_15, %c0_16] : memref<16x4xf32, #tpu.memory_space<vmem>>, vector<16x4xf32>
      %c0_17 = arith.constant 0 : index
      %c0_18 = arith.constant 0 : index
      %21 = vector.load %arg5[%c0_17, %c0_18] : memref<1x4xf32, #tpu.memory_space<vmem>>, vector<1x4xf32>
      %22 = vector.broadcast %21 : vector<1x4xf32> to vector<16x4xf32>
      %23 = arith.addf %20, %22 : vector<16x4xf32>
      %c0_19 = arith.constant 0 : index
      %c0_20 = arith.constant 0 : index
      %24 = vector.load %arg6[%c0_19, %c0_20] : memref<16x4xf32, #tpu.memory_space<vmem>>, vector<16x4xf32>
      tpu.vector_store %arg6[%c0_19, %c0_20], %23 {strides = array<i32>} : memref<16x4xf32, #tpu.memory_space<vmem>>, vector<16x4xf32>,
    } else {
    }
    return
  }
  func.func @transform_0(%arg0: i32) -> (i32, i32) {
    %c0_i32 = arith.constant 0 : i32
    %c0_i32_0 = arith.constant 0 : i32
    %c0_i32_1 = arith.constant 0 : i32
    return %c0_i32, %c0_i32_0 : i32, i32
  }
  func.func @transform_1(%arg0: i32) -> (i32, i32) {
    %c0_i32 = arith.constant 0 : i32
    %c0_i32_0 = arith.constant 0 : i32
    return %c0_i32, %arg0 : i32, i32
  }
  func.func @transform_2(%arg0: i32) -> (i32, i32) {
    %c0_i32 = arith.constant 0 : i32
    %c0_i32_0 = arith.constant 0 : i32
    return %c0_i32, %arg0 : i32, i32
  }
  func.func @transform_3(%arg0: i32) -> (i32, i32) {
    %c0_i32 = arith.constant 0 : i32
    %c0_i32_0 = arith.constant 0 : i32
    return %arg0, %c0_i32 : i32, i32
  }
  func.func @transform_4(%arg0: i32) -> (i32, i32) {
    %c0_i32 = arith.constant 0 : i32
    %c0_i32_0 = arith.constant 0 : i32
    %c0_i32_1 = arith.constant 0 : i32
    return %c0_i32, %c0_i32_0 : i32, i32
  }
  func.func @transform_5(%arg0: i32) -> (i32, i32) {
    %c0_i32 = arith.constant 0 : i32
    %c0_i32_0 = arith.constant 0 : i32
    %c0_i32_1 = arith.constant 0 : i32
    return %c0_i32, %c0_i32_0 : i32, i32
  }
}

</mosaic_0001>

<bundles_post_ra>
// kernel: tpu_custom_call.1
= control target key start
LH: loop header
LB: loop body
LE: loop exit
PB: predicated region body
PF: predicated region fallthrough
CT: control target
= control target key end

     0   :  { %10 = vsyncpa [#allocation3], 0  ;;  %s7287_s0 = inlined_call_operand.hbm [shape: bf16[16,2048], index: 0, kind: input, shape index: {}]   ;;  %s7288_s1 = inlined_call_operand.hbm [shape: bf16[2048,1024], index: 1, kind: input, shape index: {}]   ;;  %s7289_s2 = inlined_call_operand.hbm [shape: f32[1,1024], index: 2, kind: input, shape index: {}]   ;;  %s7290_s3 = inlined_call_operand.vmem [shape: bf16[1024,4], index: 3, kind: input, shape index: {}]   ;;  %s7291_s4 = inlined_call_operand.hbm [shape: f32[1,4], index: 4, kind: input, shape index: {}]   ;;  %s7292_s5 = inlined_call_operand.vmem [shape: f32[16,4], index: 5, kind: output, shape index: {}]  }
   0x1   :  { %11 = vsyncpa [#allocation5], 0 }
   0x2   :  { %13 = vsyncpa [#allocation5 + $0x1], 0 }
   0x3   :  { %14 = vsyncpa [#allocation8], 0  ;;  %s6434_s18 = smov 0   ;;  %s6436_s19 = smov 0  }
   0x4   :  { %s6438_s20 = smov 0   ;;  %s6440_s21 = smov 0  }
   0x5 LB: > { %s6455_s22 = sadd.s32 1, %s6392_s21   ;;  %s48_s23 = sadd.s32 1, %s6388_s20  ;;  %s6392_s21 = sphi %s6440_s21, %s7316_s21   ;;  %s6388_s20 = sphi %s6438_s20, %s7315_s20   ;;  %s6384_s19 = sphi %s6436_s19, %s7314_s19   ;;  %s6380_s18 = sphi %s6434_s18, %s7313_s18  }
   0x6   : > { %s45_s24 = ssub.s32 %s6392_s21, %s6455_s22  ;;  %p55_p0 = scmp.ne.s32.totalorder %s6388_s20, %s6384_s19 }
   0x7   : > { %p46_p1 = scmp.eq.s32.totalorder %s45_s24, 0  ;;  %p56_p2 = scmp.eq.s32.totalorder %s6392_s21, 0 }
   0x8   : > { %p5391_p3 = scmp.lt.s32.totalorder %s6392_s21, 2  ;;  %s203_s26 = sand.u32 1, %s6392_s21  }
   0x9   : > { %s6465_s25 = scalar_select %p46_p1, %s6388_s20, %s48_s23  }
   0xa   : > { %p57_p4 = por %p56_p2, %p55_p0  ;;  %s205_s27 = sand.u32 1, %s6388_s20  }
   0xb   : > { %s4675_s28 = sshll.u32 %s205_s27, 12  ;;  %s5253_s29 = sshll.u32 %s6392_s21, 8 }
   0xc   : > { %s6475_s7 = scalar_lea.hbm %s7288_s1, %s5253_s29  ;;  %s207_s8 = scalar_lea.vmem [#allocation4], %s4675_s28 }
   0xd   : > { %s214_s9 = sshll.u32 %s207_s8, 4  ;;  %p6477_p5 = pnand %p5391_p3, %p57_p4  ;;  %s6481_s9 = int_to_ptr.vmem [resolvable:$true] %s214_s9 }
   0xe   : > { %s6483_s11 = scalar_lea.sflag [#allocation5], %s203_s26  ;;  %s6234_s12 = scalar_lea.hbm %s6475_s7, 65536 }
   0xf   : > { %s7299_s10 = scalar_select %p6477_p5, 1, 0 }
  0x10   : > { %p6235_p6 = scmp.ne.s32.totalorder %s6475_s7, %s6234_s12  ;;  %p7294_p7 = pneg %p6477_p5 }
  0x11   : > { %s6239_s15 = scalar_lea.hbm %s7288_s1, 131072  ;;  %p6240_p10 = scmp.lt.u32.totalorder %s6475_s7, %s7288_s1 }
  0x12   : > { %p6237_p8 = pnand %p7294_p7, %p6235_p6  ;;  %p6241_p11 = scmp.lt.u32.totalorder %s6239_s15, %s6234_s12 }
  0x13   : > { %p6243_p13 = scmp.lt.u32.totalorder %s6234_s12, %s6475_s7 }
  0x14   : > { %p6238_p9 = pneg %p6237_p8  ;;  %p6242_p12 = por %p6241_p11, %p6240_p10 }
  0x16   : > { %p6244_p0 = por %p6243_p13, %p6242_p12 }
  0x18   : > { %p6245_p1 = pnand %p6244_p0, %p6238_p9 }
  0x1a   : > { %6248 = shalt.err (!%p6245_p1)
}
  0x1b   : > { %s6249_s23 = scalar_lea.vmem %s6481_s9, 65536  ;;  %s6394_s24 = smov [#allocation4]  }
  0x1c   : > { %p6250_p2 = scmp.ne.s32.totalorder %s6481_s9, %s6249_s23  ;;  %s6254_s26 = sshll.u32 %s6394_s24, 4  ;;  %s6255_s26 = int_to_ptr.vmem [resolvable:$false] %s6254_s26 }
  0x1d   : > { %s6256_s28 = scalar_lea.vmem %s6255_s26, 131072  ;;  %p6257_p6 = scmp.lt.s32.totalorder %s6481_s9, %s6255_s26 }
  0x1e   : > { %p6252_p3 = pnand %p6250_p2, %p7294_p7  ;;  %p6258_p8 = scmp.lt.s32.totalorder %s6256_s28, %s6249_s23 }
  0x20   : > { %p6253_p4 = pneg %p6252_p3  ;;  %p6259_p10 = por %p6258_p8, %p6257_p6 }
  0x22   : > { %p6260_p11 = pnand %p6259_p10, %p6253_p4 }
  0x24   : > { %6263 = shalt.err (!%p6260_p11)
}
  0x25   : > { %s6395_s29 = smov 512   ;;  %s6396_s30 = smov 256  }
  0x26   : > { %s6397_s6 = smov 16   ;;  %s6512_s8 = sadd.s32 4294967295, %s6392_s21  }
  0x27   : > { %5385 = dma.hbm_to_vmem [thread:$0]  (!%p6477_p5), %s6475_s7, 65536, %s6481_s9, %s6483_s11, %s6395_s29, %s6396_s30, %s6397_s6  }
  0x28   : > { %p61_p9 = scmp.ne.s32.totalorder %s6384_s19, %s6380_s18  ;;  %p7293_p12 = scmp.eq.s32.totalorder %s6512_s8, 0 }
  0x29   : > { %p4671_p13 = scmp.ge.s32.totalorder %s6392_s21, 1  ;;  %p166_p0 = scmp.lt.s32.totalorder %s6392_s21, 3 }
  0x2a   : > { %p6521_p1 = por %p7293_p12, %p61_p9  ;;  %s6398_s7 = smov [#allocation2]  }
  0x2b   : > { %p6526_p3 = pnand %p4671_p13, %p166_p0  ;;  %s178_s9 = sshll.u32 %s6398_s7, 4  ;;  %s179_s9 = int_to_ptr.vmem [resolvable:$true] %s178_s9 }
  0x2c   : > { %s7300_s12 = scalar_select %p6521_p1, 1, 0 }
  0x2d   : > { %s7301_s13 = scalar_select %p6526_p3, 1, 0 }
  0x2e   : > { %p5375_p4 = pneg %p6526_p3  ;;  %s6399_s14 = smov [#allocation7]  }
  0x2f   : > { %s192_s15 = sshll.u32 %s6399_s14, 4  ;;  %s6542_s16 = sshll.u32 %s205_s27, 2  ;;  %s6538_s15 = int_to_ptr.vmem [resolvable:$true] %s192_s15 }
  0x30   : > { %p6534_p6 = pnand %p5375_p4, %p7293_p12  ;;  %s6264_s24 = scalar_lea.hbm %s7287_s0, 2048 }
  0x31   : > { %p6265_p8 = scmp.ne.s32.totalorder %s7287_s0, %s6264_s24  ;;  %p6271_p13 = scmp.lt.u32.totalorder %s6264_s24, %s7287_s0 }
  0x32   : > { %p6266_p10 = pneg %p6534_p6 }
  0x34   : > { %p6267_p11 = pnand %p6266_p10, %p6265_p8 }
  0x36   : > { %p6268_p9 = pneg %p6267_p11 }
  0x38   : > { %p6273_p0 = pnand %p6271_p13, %p6268_p9 }
  0x3a   : > { %6276 = shalt.err (!%p6273_p0)
}
  0x3b   : > { %s6277_s27 = scalar_lea.vmem %s179_s9, 2048  ;;  %p6285_p7 = scmp.lt.s32.totalorder %s179_s9, %s179_s9 }
  0x3c   : > { %p6278_p4 = scmp.ne.s32.totalorder %s179_s9, %s6277_s27  ;;  %p6286_p1 = scmp.lt.s32.totalorder %s6277_s27, %s6277_s27 }
  0x3e   : > { %p6280_p2 = pnand %p6278_p4, %p6266_p10  ;;  %p6287_p3 = por %p6286_p1, %p6285_p7 }
  0x40   : > { %p6281_p12 = pneg %p6280_p2 }
  0x42   : > { %p6288_p5 = pnand %p6287_p3, %p6281_p12 }
  0x44   : > { %6291 = shalt.err (!%p6288_p5)
}
  0x45   : > { %s6400_s6 = smov 1024   ;;  %s6401_s7 = smov 64  }
  0x46   : > { %5378 = dma.hbm_to_vmem [thread:$0]  (!%p6534_p6), %s7287_s0, 2048, %s179_s9, [#allocation3], %s6400_s6, %s6400_s6, %s6401_s7  }
  0x47   : > { %s6292_s26 = scalar_lea.hbm %s7291_s4, 16 }
  0x48   : > { %p6293_p2 = scmp.ne.s32.totalorder %s7291_s4, %s6292_s26  ;;  %p6299_p12 = scmp.lt.u32.totalorder %s6292_s26, %s7291_s4 }
  0x4a   : > { %p6295_p5 = pnand %p6293_p2, %p6266_p10 }
  0x4c   : > { %p6296_p7 = pneg %p6295_p5 }
  0x4e   : > { %p6301_p1 = pnand %p6299_p12, %p6296_p7 }
  0x50   : > { %6304 = shalt.err (!%p6301_p1)
}
  0x51   : > { %s6305_s9 = scalar_lea.vmem %s6538_s15, 16  ;;  %s6312_s6 = scalar_lea.vmem %s6538_s15, 32 }
  0x52   : > { %p6306_p3 = scmp.ne.s32.totalorder %s6538_s15, %s6305_s9  ;;  %p6313_p9 = scmp.lt.s32.totalorder %s6538_s15, %s6538_s15 }
  0x53   : > { %p6314_p13 = scmp.lt.s32.totalorder %s6312_s6, %s6305_s9 }
  0x54   : > { %p6308_p8 = pnand %p6306_p3, %p6266_p10 }
  0x55   : > { %p6315_p0 = por %p6314_p13, %p6313_p9 }
  0x56   : > { %p6309_p11 = pneg %p6308_p8 }
  0x58   : > { %p6316_p4 = pnand %p6315_p0, %p6309_p11 }
  0x5a   : > { %6319 = shalt.err (!%p6316_p4)
}
  0x5b   : > { %5381 = dma.hbm_to_vmem [thread:$0]  (!%p6534_p6), %s7291_s4, 16, %s6538_s15, [#allocation8]  }
  0x5c   : > { %s5254_s17 = sshll.u32 %s6392_s21, 6  ;;  %s228_s23 = scalar_lea.vmem [#allocation6], %s6542_s16 }
  0x5d   : > { %s236_s24 = sshll.u32 %s228_s23, 4  ;;  %s234_s29 = scalar_lea.hbm %s7289_s2, %s5254_s17  ;;  %s237_s24 = int_to_ptr.vmem [resolvable:$true] %s236_s24 }
  0x5e   : > { %s6320_s30 = scalar_lea.hbm %s234_s29, 64  ;;  %p7303_p2 = scmp.ne.s32.totalorder %s7299_s10, 0 }
  0x5f   : > { %p6321_p10 = scmp.ne.s32.totalorder %s234_s29, %s6320_s30  ;;  %s6325_s9 = scalar_lea.hbm %s7289_s2, 128 }
  0x60   : > { %p7304_p5 = pneg %p7303_p2  ;;  %p6326_p6 = scmp.lt.u32.totalorder %s234_s29, %s7289_s2 }
  0x61   : > { %p6327_p1 = scmp.lt.u32.totalorder %s6325_s9, %s6320_s30  ;;  %p6329_p8 = scmp.lt.u32.totalorder %s6320_s30, %s234_s29 }
  0x62   : > { %p6323_p7 = pnand %p6321_p10, %p7304_p5 }
  0x63   : > { %p6328_p3 = por %p6327_p1, %p6326_p6 }
  0x64   : > { %p6324_p12 = pneg %p6323_p7 }
  0x65   : > { %p6330_p11 = por %p6329_p8, %p6328_p3 }
  0x67   : > { %p6331_p9 = pnand %p6330_p11, %p6324_p12 }
  0x69   : > { %6334 = shalt.err (!%p6331_p9)
}
  0x6a   : > { %s6335_s21 = scalar_lea.vmem %s237_s24, 64  ;;  %p7305_p0 = pmov %p7304_p5 }
  0x6b   : > { %p6336_p13 = scmp.ne.s32.totalorder %s237_s24, %s6335_s21  ;;  %s6402_s16 = smov [#allocation6]  }
  0x6c   : > { %s6340_s7 = sshll.u32 %s6402_s16, 4  ;;  %s6341_s7 = int_to_ptr.vmem [resolvable:$false] %s6340_s7 }
  0x6d   : > { %p6338_p4 = pnand %p6336_p13, %p7305_p0  ;;  %s6342_s14 = scalar_lea.vmem %s6341_s7, 128 }
  0x6e   : > { %p6343_p5 = scmp.lt.s32.totalorder %s237_s24, %s6341_s7  ;;  %p6344_p7 = scmp.lt.s32.totalorder %s6342_s14, %s6335_s21 }
  0x6f   : > { %p6339_p10 = pneg %p6338_p4 }
  0x70   : > { %p6345_p1 = por %p6344_p7, %p6343_p5 }
  0x72   : > { %p6346_p6 = pnand %p6345_p1, %p6339_p10 }
  0x74   : > { %6349 = shalt.err (!%p6346_p6)
}
  0x75   : > { %5388 = dma.hbm_to_vmem [thread:$0]  (!%p7303_p2), %s234_s29, 64, %s237_s24, %s6483_s11  }
  0x76   : > { %p7306_p12 = scmp.ne.s32.totalorder %s7301_s13, 0 }
  0x77   : > { %p7307_p3 = scmp.eq.s32.totalorder (!%p7306_p12), %s6512_s8, 0 }
  0x78   : > { %254 = sbr.rel (%p7306_p12) target bundleno = 1103 (0x44f), region = 40 }
  0x7f   : > { %6367 = dma.done.wait (%p7307_p3), [#allocation3], 2048   ;;  %p7308_p8 = pmov %p7307_p3 }
  0x80   : > { %s260_s17 = sand.u32 1, %s6512_s8   ;;  %s262_s23 = sand.u32 1, %s6384_s19  }
  0x81   : > { %6369 = vsyncadd (%p7308_p8), [#allocation3], 4294965248  ;;  %s4683_s26 = sshll.u32 %s262_s23, 12  ;;  %s261_s28 = scalar_lea.sflag [#allocation5], %s260_s17 }
  0x82   : > { %s6620_s30 = scalar_lea.vmem [#allocation4], %s4683_s26  ;;  %p7309_p11 = scmp.ne.s32.totalorder %s7300_s12, 0 }
  0x84   : > { %6371 = dma.done.wait (%p7309_p11), %s261_s28, 65600  }
  0x85   : > { %6373 = vsyncadd (%p7309_p11), %s261_s28, 4294901696  ;;  %s6626_s10 = sshll.u32 %s262_s23, 2  ;;  %p7310_p2 = pmov %p7307_p3 }
  0x86   : > { %s273_s11 = scalar_lea.vmem [#allocation6], %s6626_s10 }
  0x87   : > { %6375 = dma.done.wait (%p7310_p2), [#allocation8], 16   ;;  %p7311_p9 = pmov %p7310_p2 }
  0x88   : > { %v5434_v0 = vld [vmem:[%s6620_s30 + $0x4] ss:$16 sps:$4 sm:$0xff]   ;;  %v5436_v1 = vld [vmem:[%s6620_s30 + $0xc] ss:$16 sps:$4 sm:$0xff]   ;;  %v5438_v2 = vld [vmem:[%s6620_s30] ss:$16 sps:$4 sm:$0xff]  }
  0x89   : > { %6377 = vsyncadd (%p7311_p9), [#allocation8], 4294967280  ;;  %3508 = vmatprep.subr.bf16.mxu0 %v5434_v0  ;;  %v5439_v3 = vld [vmem:[%s6620_s30 + $0x8] ss:$16 sps:$4 sm:$0xff]   ;;  %3852 = vmatprep.subr.bf16.mxu1 %v5436_v1  ;;  %v5440_v4 = vld [vmem:[%s6620_s30 + $0x24] ss:$16 sps:$4 sm:$0xff]  }
  0x8a   : > { %3509 = vmatpush1.bf16.msra.mxu0 %v5438_v2  ;;  %3853 = vmatpush1.bf16.msra.mxu1 %v5439_v3  ;;  %v5442_v5 = vld [vmem:[%s6620_s30 + $0x2c] ss:$16 sps:$4 sm:$0xff]   ;;  %v5444_v6 = vld [vmem:[%s6620_s30 + $0x20] ss:$16 sps:$4 sm:$0xff]   ;;  %v5445_v7 = vld [vmem:[%s6620_s30 + $0x28] ss:$16 sps:$4 sm:$0xff]  }
  0x8b   : > { %3510 = vmatprep.subr.bf16.mxu0 %v5440_v4  ;;  %3854 = vmatprep.subr.bf16.mxu1 %v5442_v5  ;;  %v5446_v8 = vld [vmem:[%s6620_s30 + $0x44] ss:$16 sps:$4 sm:$0xff]   ;;  %v5448_v9 = vld [vmem:[%s6620_s30 + $0x4c] ss:$16 sps:$4 sm:$0xff]   ;;  %v5450_v10 = vld [vmem:[%s6620_s30 + $0x40] ss:$16 sps:$4 sm:$0xff]  }
  0x8c   : > { %v5451_v11 = vld [vmem:[%s6620_s30 + $0x48] ss:$16 sps:$4 sm:$0xff]   ;;  %v5452_v12 = vld [vmem:[%s6620_s30 + $0x64] ss:$16 sps:$4 sm:$0xff]   ;;  %v5454_v13 = vld [vmem:[%s6620_s30 + $0x6c] ss:$16 sps:$4 sm:$0xff]  }
  0x8d   : > { %v5456_v14 = vld [vmem:[%s6620_s30 + $0x60] ss:$16 sps:$4 sm:$0xff]   ;;  %v5457_v15 = vld [vmem:[%s6620_s30 + $0x68] ss:$16 sps:$4 sm:$0xff]   ;;  %v5458_v16 = vld [vmem:[%s6620_s30 + $0x84] ss:$16 sps:$4 sm:$0xff]  }
  0x8e   : > { %3511 = vmatpush1.bf16.msra.mxu0 %v5444_v6  ;;  %3855 = vmatpush1.bf16.msra.mxu1 %v5445_v7  ;;  %v5460_v17 = vld [vmem:[%s6620_s30 + $0x8c] ss:$16 sps:$4 sm:$0xff]   ;;  %v5462_v18 = vld [vmem:[%s6620_s30 + $0x80] ss:$16 sps:$4 sm:$0xff]   ;;  %v5463_v19 = vld [vmem:[%s6620_s30 + $0x88] ss:$16 sps:$4 sm:$0xff]  }
  0x8f   : > { %3512 = vmatprep.subr.bf16.mxu0 %v5446_v8  ;;  %3856 = vmatprep.subr.bf16.mxu1 %v5448_v9  ;;  %v5464_v20 = vld [vmem:[%s6620_s30 + $0xa4] ss:$16 sps:$4 sm:$0xff]   ;;  %v5466_v21 = vld [vmem:[%s6620_s30 + $0xac] ss:$16 sps:$4 sm:$0xff]   ;;  %v5468_v22 = vld [vmem:[%s6620_s30 + $0xa0] ss:$16 sps:$4 sm:$0xff]  }
  0x90   : > { %v5469_v23 = vld [vmem:[%s6620_s30 + $0xa8] ss:$16 sps:$4 sm:$0xff]   ;;  %v5470_v24 = vld [vmem:[%s6620_s30 + $0xc4] ss:$16 sps:$4 sm:$0xff]   ;;  %v5472_v25 = vld [vmem:[%s6620_s30 + $0xcc] ss:$16 sps:$4 sm:$0xff]  }
  0x91   : > { %v5474_v26 = vld [vmem:[%s6620_s30 + $0xc0] ss:$16 sps:$4 sm:$0xff]   ;;  %v5475_v27 = vld [vmem:[%s6620_s30 + $0xc8] ss:$16 sps:$4 sm:$0xff]   ;;  %v5476_v28 = vld [vmem:[%s6620_s30 + $0xe4] ss:$16 sps:$4 sm:$0xff]  }
  0x92   : > { %3513 = vmatpush1.bf16.msra.mxu0 %v5450_v10  ;;  %3857 = vmatpush1.bf16.msra.mxu1 %v5451_v11  ;;  %v5478_v29 = vld [vmem:[%s6620_s30 + $0xec] ss:$16 sps:$4 sm:$0xff]   ;;  %v5480_v30 = vld [vmem:[%s6620_s30 + $0xe0] ss:$16 sps:$4 sm:$0xff]   ;;  %v5481_v31 = vld [vmem:[%s6620_s30 + $0xe8] ss:$16 sps:$4 sm:$0xff]  }
  0x93   : > { %3514 = vmatprep.subr.bf16.mxu0 %v5452_v12  ;;  %3858 = vmatprep.subr.bf16.mxu1 %v5454_v13  ;;  %v5482_v32 = vld [vmem:[%s6620_s30 + $0x104] ss:$16 sps:$4 sm:$0xff]   ;;  %v5484_v33 = vld [vmem:[%s6620_s30 + $0x10c] ss:$16 sps:$4 sm:$0xff]   ;;  %v5486_v34 = vld [vmem:[%s6620_s30 + $0x100] ss:$16 sps:$4 sm:$0xff]  }
  0x94   : > { %v5487_v35 = vld [vmem:[%s6620_s30 + $0x108] ss:$16 sps:$4 sm:$0xff]   ;;  %v5488_v36 = vld [vmem:[%s6620_s30 + $0x124] ss:$16 sps:$4 sm:$0xff]   ;;  %v5490_v37 = vld [vmem:[%s6620_s30 + $0x12c] ss:$16 sps:$4 sm:$0xff]  }
  0x95   : > { %v5492_v38 = vld [vmem:[%s6620_s30 + $0x120] ss:$16 sps:$4 sm:$0xff]   ;;  %v5493_v39 = vld [vmem:[%s6620_s30 + $0x128] ss:$16 sps:$4 sm:$0xff]   ;;  %v5494_v40 = vld [vmem:[%s6620_s30 + $0x144] ss:$16 sps:$4 sm:$0xff]  }
  0x96   : > { %3515 = vmatpush1.bf16.msra.mxu0 %v5456_v14  ;;  %3859 = vmatpush1.bf16.msra.mxu1 %v5457_v15  ;;  %v5496_v41 = vld [vmem:[%s6620_s30 + $0x14c] ss:$16 sps:$4 sm:$0xff]   ;;  %v5498_v42 = vld [vmem:[%s6620_s30 + $0x140] ss:$16 sps:$4 sm:$0xff]   ;;  %v5499_v43 = vld [vmem:[%s6620_s30 + $0x148] ss:$16 sps:$4 sm:$0xff]  }
  0x97   : > { %3516 = vmatprep.subr.bf16.mxu0 %v5458_v16  ;;  %3860 = vmatprep.subr.bf16.mxu1 %v5460_v17  ;;  %v5500_v44 = vld [vmem:[%s6620_s30 + $0x164] ss:$16 sps:$4 sm:$0xff]   ;;  %v5502_v45 = vld [vmem:[%s6620_s30 + $0x16c] ss:$16 sps:$4 sm:$0xff]   ;;  %v5504_v48 = vld [vmem:[%s6620_s30 + $0x160] ss:$16 sps:$4 sm:$0xff]  }
  0x98   : > { %v318_v46 = vld [vmem:[#allocation2] sm:$0xff]  ;;  %v5505_v49 = vld [vmem:[%s6620_s30 + $0x168] ss:$16 sps:$4 sm:$0xff]   ;;  %v5508_v52 = vld [vmem:[%s6620_s30 + $0x18c] ss:$16 sps:$4 sm:$0xff]   ;;  %s4686_s12 = sshll.u32 %s6512_s8, 6 }
  0x99   : > { %v326_v47 = vld [vmem:[#allocation2 + $0x40] sm:$0xff]  ;;  %v5511_v54 = vld [vmem:[%s6620_s30 + $0x188] ss:$16 sps:$4 sm:$0xff]   ;;  %v5514_v56 = vld [vmem:[%s6620_s30 + $0x1ac] ss:$16 sps:$4 sm:$0xff]   ;;  %p312_p13 = scmp.lt.s32.totalorder %s4686_s12, 127 }
  0x9a   : > { %3517 = vmatpush1.bf16.msra.mxu0 %v5462_v18  ;;  %3861 = vmatpush1.bf16.msra.mxu1 %v5463_v19  ;;  %v4689_v50 = vcombine.high %v318_v46, %v326_v47  ;;  %v5506_v51 = vld [vmem:[%s6620_s30 + $0x184] ss:$16 sps:$4 sm:$0xff]   ;;  %v5510_v53 = vld [vmem:[%s6620_s30 + $0x180] ss:$16 sps:$4 sm:$0xff]   ;;  %v5517_v58 = vld [vmem:[%s6620_s30 + $0x1a8] ss:$16 sps:$4 sm:$0xff]   ;;  %v4688_v5 = vcombine.low %v318_v46, %v326_v47 }
  0x9b   : > { %3518 = vmatprep.subr.bf16.mxu0 %v5464_v20  ;;  %3862 = vmatprep.subr.bf16.mxu1 %v5466_v21  ;;  %v5512_v55 = vld [vmem:[%s6620_s30 + $0x1a4] ss:$16 sps:$4 sm:$0xff]   ;;  %v5516_v57 = vld [vmem:[%s6620_s30 + $0x1a0] ss:$16 sps:$4 sm:$0xff]   ;;  %v5520_v60 = vld [vmem:[%s6620_s30 + $0x1cc] ss:$16 sps:$4 sm:$0xff]  }
  0x9c   : > { %3540 = vmatprep.mubr.bf16.mxu0 %v4689_v50  ;;  %3884 = vmatprep.mubr.bf16.mxu1 %v4689_v50  ;;  %v5518_v59 = vld [vmem:[%s6620_s30 + $0x1c4] ss:$16 sps:$4 sm:$0xff]   ;;  %v5522_v61 = vld [vmem:[%s6620_s30 + $0x1c0] ss:$16 sps:$4 sm:$0xff]   ;;  %v5523_v62 = vld [vmem:[%s6620_s30 + $0x1c8] ss:$16 sps:$4 sm:$0xff]  }
  0x9d   : > { %v5524_v63 = vld [vmem:[%s6620_s30 + $0x1e4] ss:$16 sps:$4 sm:$0xff]   ;;  %v5526_v0 = vld [vmem:[%s6620_s30 + $0x1ec] ss:$16 sps:$4 sm:$0xff]   ;;  %v5528_v1 = vld [vmem:[%s6620_s30 + $0x1e0] ss:$16 sps:$4 sm:$0xff]  }
  0x9e   : > { %3519 = vmatpush1.bf16.msra.mxu0 %v5468_v22  ;;  %3863 = vmatpush1.bf16.msra.mxu1 %v5469_v23  ;;  %v5529_v2 = vld [vmem:[%s6620_s30 + $0x1e8] ss:$16 sps:$4 sm:$0xff]   ;;  %v5532_v3 = vld [vmem:[%s6620_s30 + $0x204] ss:$16 sps:$4 sm:$0xff]   ;;  %v5535_v4 = vld [vmem:[%s6620_s30 + $0x20c] ss:$16 sps:$4 sm:$0xff]  }
  0x9f   : > { %3520 = vmatprep.subr.bf16.mxu0 %v5470_v24  ;;  %3864 = vmatprep.subr.bf16.mxu1 %v5472_v25  ;;  %v5530_v6 = vld [vmem:[%s6620_s30 + $0x200] ss:$16 sps:$4 sm:$0xff]   ;;  %v5533_v7 = vld [vmem:[%s6620_s30 + $0x208] ss:$16 sps:$4 sm:$0xff]   ;;  %v5538_v8 = vld [vmem:[%s6620_s30 + $0x224] ss:$16 sps:$4 sm:$0xff]  }
  0xa0   : > { %v5541_v9 = vld [vmem:[%s6620_s30 + $0x22c] ss:$16 sps:$4 sm:$0xff]   ;;  %v5536_v10 = vld [vmem:[%s6620_s30 + $0x220] ss:$16 sps:$4 sm:$0xff]   ;;  %v5539_v11 = vld [vmem:[%s6620_s30 + $0x228] ss:$16 sps:$4 sm:$0xff]  }
  0xa1   : > { %v5544_v12 = vld [vmem:[%s6620_s30 + $0x244] ss:$16 sps:$4 sm:$0xff]   ;;  %v5547_v13 = vld [vmem:[%s6620_s30 + $0x24c] ss:$16 sps:$4 sm:$0xff]   ;;  %v5542_v14 = vld [vmem:[%s6620_s30 + $0x240] ss:$16 sps:$4 sm:$0xff]  }
  0xa2   : > { %3521 = vmatpush1.bf16.msra.mxu0 %v5474_v26  ;;  %3865 = vmatpush1.bf16.msra.mxu1 %v5475_v27  ;;  %v5545_v15 = vld [vmem:[%s6620_s30 + $0x248] ss:$16 sps:$4 sm:$0xff]   ;;  %v5550_v16 = vld [vmem:[%s6620_s30 + $0x264] ss:$16 sps:$4 sm:$0xff]   ;;  %v5553_v17 = vld [vmem:[%s6620_s30 + $0x26c] ss:$16 sps:$4 sm:$0xff]  }
  0xa3   : > { %3522 = vmatprep.subr.bf16.mxu0 %v5476_v28  ;;  %3866 = vmatprep.subr.bf16.mxu1 %v5478_v29  ;;  %v5548_v18 = vld [vmem:[%s6620_s30 + $0x260] ss:$16 sps:$4 sm:$0xff]   ;;  %v5551_v19 = vld [vmem:[%s6620_s30 + $0x268] ss:$16 sps:$4 sm:$0xff]   ;;  %v5556_v20 = vld [vmem:[%s6620_s30 + $0x284] ss:$16 sps:$4 sm:$0xff]  }
  0xa4   : > { %v5559_v21 = vld [vmem:[%s6620_s30 + $0x28c] ss:$16 sps:$4 sm:$0xff]   ;;  %v5554_v22 = vld [vmem:[%s6620_s30 + $0x280] ss:$16 sps:$4 sm:$0xff]   ;;  %v5557_v23 = vld [vmem:[%s6620_s30 + $0x288] ss:$16 sps:$4 sm:$0xff]  }
  0xa5   : > { %v5562_v24 = vld [vmem:[%s6620_s30 + $0x2a4] ss:$16 sps:$4 sm:$0xff]   ;;  %v5565_v25 = vld [vmem:[%s6620_s30 + $0x2ac] ss:$16 sps:$4 sm:$0xff]   ;;  %v5560_v26 = vld [vmem:[%s6620_s30 + $0x2a0] ss:$16 sps:$4 sm:$0xff]  }
  0xa6   : > { %3523 = vmatpush1.bf16.msra.mxu0 %v5480_v30  ;;  %3867 = vmatpush1.bf16.msra.mxu1 %v5481_v31  ;;  %v5563_v27 = vld [vmem:[%s6620_s30 + $0x2a8] ss:$16 sps:$4 sm:$0xff]   ;;  %v5568_v28 = vld [vmem:[%s6620_s30 + $0x2c4] ss:$16 sps:$4 sm:$0xff]   ;;  %v5571_v29 = vld [vmem:[%s6620_s30 + $0x2cc] ss:$16 sps:$4 sm:$0xff]  }
  0xa7   : > { %3524 = vmatprep.subr.bf16.mxu0 %v5482_v32  ;;  %3868 = vmatprep.subr.bf16.mxu1 %v5484_v33  ;;  %v6723_v30 = vld [vmem:[#allocation2 + $0x8] sm:$0xff]  ;;  %v5566_v32 = vld [vmem:[%s6620_s30 + $0x2c0] ss:$16 sps:$4 sm:$0xff]   ;;  %v5592_v47 = vld [vmem:[%s6620_s30 + $0x344] ss:$16 sps:$4 sm:$0xff]   ;;  %s7318_s12 = smov (!%p312_p13, %s4686_s12), 127 }
  0xa8   : > { %v6725_v31 = vld [vmem:[#allocation2 + $0x48] sm:$0xff]  ;;  %s4687_s13 = sshll.u32 %s7318_s12, 2  ;;  %p7312_p0 = scmp.ne.s32.totalorder %s6512_s8, 0 }
  0xa9   : > { %v5569_v33 = vld [vmem:[%s6620_s30 + $0x2c8] ss:$16 sps:$4 sm:$0xff]   ;;  %s7081_s18 = scalar_lea.vmem %s7290_s3, %s4687_s13  ;;  %vm4550_vm0 = vcmask (!%p7312_p0), 31744  }
  0xaa   : > { %3525 = vmatpush1.bf16.msra.mxu0 %v5486_v34  ;;  %3869 = vmatpush1.bf16.msra.mxu1 %v5487_v35  ;;  %v4691_v34 = vcombine.high %v6723_v30, %v6725_v31  ;;  %v5574_v35 = vld [vmem:[%s6620_s30 + $0x2e4] ss:$16 sps:$4 sm:$0xff]   ;;  %v5587_v46 = vld [vmem:[%s6620_s30 + $0x328] ss:$16 sps:$4 sm:$0xff]  }
  0xab   : > { %3526 = vmatprep.subr.bf16.mxu0 %v5488_v36  ;;  %3870 = vmatprep.subr.bf16.mxu1 %v5490_v37  ;;  %v5577_v36 = vld [vmem:[%s6620_s30 + $0x2ec] ss:$16 sps:$4 sm:$0xff]   ;;  %v5572_v37 = vld [vmem:[%s6620_s30 + $0x2e0] ss:$16 sps:$4 sm:$0xff]   ;;  %v5593_v50 = vld [vmem:[%s6620_s30 + $0x348] ss:$16 sps:$4 sm:$0xff]  }
  0xae   : > { %3527 = vmatpush1.bf16.msra.mxu0 %v5492_v38  ;;  %3871 = vmatpush1.bf16.msra.mxu1 %v5493_v39  ;;  %v5575_v38 = vld [vmem:[%s6620_s30 + $0x2e8] ss:$16 sps:$4 sm:$0xff]   ;;  %v5580_v39 = vld [vmem:[%s6620_s30 + $0x304] ss:$16 sps:$4 sm:$0xff]  }
  0xaf   : > { %3528 = vmatprep.subr.bf16.mxu0 %v5494_v40  ;;  %3872 = vmatprep.subr.bf16.mxu1 %v5496_v41  ;;  %v5583_v40 = vld [vmem:[%s6620_s30 + $0x30c] ss:$16 sps:$4 sm:$0xff]   ;;  %v5578_v41 = vld [vmem:[%s6620_s30 + $0x300] ss:$16 sps:$4 sm:$0xff]  }
  0xb2   : > { %3529 = vmatpush1.bf16.msra.mxu0 %v5498_v42  ;;  %3873 = vmatpush1.bf16.msra.mxu1 %v5499_v43  ;;  %v5581_v42 = vld [vmem:[%s6620_s30 + $0x308] ss:$16 sps:$4 sm:$0xff]   ;;  %v5586_v43 = vld [vmem:[%s6620_s30 + $0x324] ss:$16 sps:$4 sm:$0xff]  }
  0xb3   : > { %3530 = vmatprep.subr.bf16.mxu0 %v5500_v44  ;;  %3874 = vmatprep.subr.bf16.mxu1 %v5502_v45  ;;  %v5589_v44 = vld [vmem:[%s6620_s30 + $0x32c] ss:$16 sps:$4 sm:$0xff]   ;;  %v5584_v45 = vld [vmem:[%s6620_s30 + $0x320] ss:$16 sps:$4 sm:$0xff]  }
  0xb6   : > { %3531 = vmatpush1.bf16.msra.mxu0 %v5504_v48  ;;  %3875 = vmatpush1.bf16.msra.mxu1 %v5505_v49  ;;  %v5595_v48 = vld [vmem:[%s6620_s30 + $0x34c] ss:$16 sps:$4 sm:$0xff]   ;;  %v5590_v49 = vld [vmem:[%s6620_s30 + $0x340] ss:$16 sps:$4 sm:$0xff]  }
  0xb7   : > { %3532 = vmatprep.subr.bf16.mxu0 %v5506_v51  ;;  %3876 = vmatprep.subr.bf16.mxu1 %v5508_v52  ;;  %v5598_v51 = vld [vmem:[%s6620_s30 + $0x364] ss:$16 sps:$4 sm:$0xff]   ;;  %v5601_v52 = vld [vmem:[%s6620_s30 + $0x36c] ss:$16 sps:$4 sm:$0xff]  }
  0xba   : > { %3533 = vmatpush1.bf16.msra.mxu0 %v5510_v53  ;;  %3877 = vmatpush1.bf16.msra.mxu1 %v5511_v54  ;;  %v5596_v53 = vld [vmem:[%s6620_s30 + $0x360] ss:$16 sps:$4 sm:$0xff]   ;;  %v5599_v54 = vld [vmem:[%s6620_s30 + $0x368] ss:$16 sps:$4 sm:$0xff]  }
  0xbb   : > { %3534 = vmatprep.subr.bf16.mxu0 %v5512_v55  ;;  %3878 = vmatprep.subr.bf16.mxu1 %v5514_v56  ;;  %v5604_v55 = vld [vmem:[%s6620_s30 + $0x384] ss:$16 sps:$4 sm:$0xff]   ;;  %v5607_v56 = vld [vmem:[%s6620_s30 + $0x38c] ss:$16 sps:$4 sm:$0xff]  }
  0xbe   : > { %3535 = vmatpush1.bf16.msra.mxu0 %v5516_v57  ;;  %3879 = vmatpush1.bf16.msra.mxu1 %v5517_v58  ;;  %v5602_v57 = vld [vmem:[%s6620_s30 + $0x380] ss:$16 sps:$4 sm:$0xff]   ;;  %v5605_v58 = vld [vmem:[%s6620_s30 + $0x388] ss:$16 sps:$4 sm:$0xff]  }
  0xbf   : > { %3536 = vmatprep.subr.bf16.mxu0 %v5518_v59  ;;  %3880 = vmatprep.subr.bf16.mxu1 %v5520_v60  ;;  %v5610_v59 = vld [vmem:[%s6620_s30 + $0x3a4] ss:$16 sps:$4 sm:$0xff]   ;;  %v5613_v60 = vld [vmem:[%s6620_s30 + $0x3ac] ss:$16 sps:$4 sm:$0xff]  }
  0xc2   : > { %3537 = vmatpush1.bf16.msra.mxu0 %v5522_v61  ;;  %3881 = vmatpush1.bf16.msra.mxu1 %v5523_v62  ;;  %v5608_v61 = vld [vmem:[%s6620_s30 + $0x3a0] ss:$16 sps:$4 sm:$0xff]   ;;  %v5611_v62 = vld [vmem:[%s6620_s30 + $0x3a8] ss:$16 sps:$4 sm:$0xff]  }
  0xc3   : > { %3538 = vmatprep.subr.bf16.mxu0 %v5524_v63  ;;  %3882 = vmatprep.subr.bf16.mxu1 %v5526_v0  ;;  %v5616_v63 = vld [vmem:[%s6620_s30 + $0x3c4] ss:$16 sps:$4 sm:$0xff]   ;;  %v5619_v0 = vld [vmem:[%s6620_s30 + $0x3cc] ss:$16 sps:$4 sm:$0xff]  }
  0xc6   : > { %3539 = vmatpush1.bf16.msra.mxu0 %v5528_v1  ;;  %3883 = vmatpush1.bf16.msra.mxu1 %v5529_v2  ;;  %v5614_v1 = vld [vmem:[%s6620_s30 + $0x3c0] ss:$16 sps:$4 sm:$0xff]   ;;  %v5617_v2 = vld [vmem:[%s6620_s30 + $0x3c8] ss:$16 sps:$4 sm:$0xff]  }
  0xc7   : > { %3551 = vmatprep.subr.bf16.mxu0 %v5532_v3  ;;  %3895 = vmatprep.subr.bf16.mxu1 %v5535_v4  ;;  %v5622_v3 = vld [vmem:[%s6620_s30 + $0x3e4] ss:$16 sps:$4 sm:$0xff]   ;;  %v5625_v4 = vld [vmem:[%s6620_s30 + $0x3ec] ss:$16 sps:$4 sm:$0xff]  }
  0xc9   : > { %3541 = vmatmul.mubr.bf16.vlgmr.msra.gmra.mrb[0].mxu0 %v4688_v5  ;;  %3885 = vmatmul.mubr.bf16.vlgmr.msra.gmra.mrb[0].mxu1 %v4688_v5  ;;  %v5620_v5 = vld [vmem:[%s6620_s30 + $0x3e0] ss:$16 sps:$4 sm:$0xff]  }
  0xca   : > { %3552 = vmatpush1.bf16.msra.mxu0 %v5530_v6  ;;  %3896 = vmatpush1.bf16.msra.mxu1 %v5533_v7  ;;  %v5623_v6 = vld [vmem:[%s6620_s30 + $0x3e8] ss:$16 sps:$4 sm:$0xff]   ;;  %v5628_v7 = vld [vmem:[%s6620_s30 + $0x404] ss:$16 sps:$4 sm:$0xff]  }
  0xcb   : > { %3553 = vmatprep.subr.bf16.mxu0 %v5538_v8  ;;  %3897 = vmatprep.subr.bf16.mxu1 %v5541_v9  ;;  %v5631_v8 = vld [vmem:[%s6620_s30 + $0x40c] ss:$16 sps:$4 sm:$0xff]   ;;  %v4690_v9 = vcombine.low %v6723_v30, %v6725_v31  ;;  %v5653_v30 = vld [vmem:[%s6620_s30 + $0x488] ss:$16 sps:$4 sm:$0xff]   ;;  %v5658_v31 = vld [vmem:[%s6620_s30 + $0x4a4] ss:$16 sps:$4 sm:$0xff]  }
  0xcc   : > { %3583 = vmatprep.mubr.bf16.mxu0 %v4691_v34  ;;  %3927 = vmatprep.mubr.bf16.mxu1 %v4691_v34  ;;  %v5659_v34 = vld [vmem:[%s6620_s30 + $0x4a8] ss:$16 sps:$4 sm:$0xff]  }
  0xce   : > { %3554 = vmatpush1.bf16.msra.mxu0 %v5536_v10  ;;  %3898 = vmatpush1.bf16.msra.mxu1 %v5539_v11  ;;  %v5626_v10 = vld [vmem:[%s6620_s30 + $0x400] ss:$16 sps:$4 sm:$0xff]   ;;  %v5629_v11 = vld [vmem:[%s6620_s30 + $0x408] ss:$16 sps:$4 sm:$0xff]  }
  0xcf   : > { %3555 = vmatprep.subr.bf16.mxu0 %v5544_v12  ;;  %3899 = vmatprep.subr.bf16.mxu1 %v5547_v13  ;;  %v5634_v12 = vld [vmem:[%s6620_s30 + $0x424] ss:$16 sps:$4 sm:$0xff]   ;;  %v5637_v13 = vld [vmem:[%s6620_s30 + $0x42c] ss:$16 sps:$4 sm:$0xff]  }
  0xd2   : > { %3556 = vmatpush1.bf16.msra.mxu0 %v5542_v14  ;;  %3900 = vmatpush1.bf16.msra.mxu1 %v5545_v15  ;;  %v6775_v14 = vld [vmem:[#allocation2 + $0x10] sm:$0xff] }
  0xd3   : > { %3557 = vmatprep.subr.bf16.mxu0 %v5550_v16  ;;  %3901 = vmatprep.subr.bf16.mxu1 %v5553_v17  ;;  %v6777_v15 = vld [vmem:[#allocation2 + $0x50] sm:$0xff] }
  0xd4   : > { %v4693_v16 = vcombine.high %v6775_v14, %v6777_v15  ;;  %v5632_v17 = vld [vmem:[%s6620_s30 + $0x420] ss:$16 sps:$4 sm:$0xff]  }
  0xd6   : > { %3558 = vmatpush1.bf16.msra.mxu0 %v5548_v18  ;;  %3902 = vmatpush1.bf16.msra.mxu1 %v5551_v19  ;;  %v5635_v18 = vld [vmem:[%s6620_s30 + $0x428] ss:$16 sps:$4 sm:$0xff]   ;;  %v5640_v19 = vld [vmem:[%s6620_s30 + $0x444] ss:$16 sps:$4 sm:$0xff]  }
  0xd7   : > { %3559 = vmatprep.subr.bf16.mxu0 %v5556_v20  ;;  %3903 = vmatprep.subr.bf16.mxu1 %v5559_v21  ;;  %v5643_v20 = vld [vmem:[%s6620_s30 + $0x44c] ss:$16 sps:$4 sm:$0xff]   ;;  %v5638_v21 = vld [vmem:[%s6620_s30 + $0x440] ss:$16 sps:$4 sm:$0xff]  }
  0xda   : > { %3560 = vmatpush1.bf16.msra.mxu0 %v5554_v22  ;;  %3904 = vmatpush1.bf16.msra.mxu1 %v5557_v23  ;;  %v5641_v22 = vld [vmem:[%s6620_s30 + $0x448] ss:$16 sps:$4 sm:$0xff]   ;;  %v5646_v23 = vld [vmem:[%s6620_s30 + $0x464] ss:$16 sps:$4 sm:$0xff]  }
  0xdb   : > { %3561 = vmatprep.subr.bf16.mxu0 %v5562_v24  ;;  %3905 = vmatprep.subr.bf16.mxu1 %v5565_v25  ;;  %v5649_v24 = vld [vmem:[%s6620_s30 + $0x46c] ss:$16 sps:$4 sm:$0xff]   ;;  %v5644_v25 = vld [vmem:[%s6620_s30 + $0x460] ss:$16 sps:$4 sm:$0xff]  }
  0xde   : > { %3562 = vmatpush1.bf16.msra.mxu0 %v5560_v26  ;;  %3906 = vmatpush1.bf16.msra.mxu1 %v5563_v27  ;;  %v5647_v26 = vld [vmem:[%s6620_s30 + $0x468] ss:$16 sps:$4 sm:$0xff]   ;;  %v5652_v27 = vld [vmem:[%s6620_s30 + $0x484] ss:$16 sps:$4 sm:$0xff]  }
  0xdf   : > { %3563 = vmatprep.subr.bf16.mxu0 %v5568_v28  ;;  %3907 = vmatprep.subr.bf16.mxu1 %v5571_v29  ;;  %v5655_v28 = vld [vmem:[%s6620_s30 + $0x48c] ss:$16 sps:$4 sm:$0xff]   ;;  %v5650_v29 = vld [vmem:[%s6620_s30 + $0x480] ss:$16 sps:$4 sm:$0xff]  }
  0xe2   : > { %3564 = vmatpush1.bf16.msra.mxu0 %v5566_v32  ;;  %3908 = vmatpush1.bf16.msra.mxu1 %v5569_v33  ;;  %v5661_v32 = vld [vmem:[%s6620_s30 + $0x4ac] ss:$16 sps:$4 sm:$0xff]   ;;  %v5656_v33 = vld [vmem:[%s6620_s30 + $0x4a0] ss:$16 sps:$4 sm:$0xff]  }
  0xe3   : > { %3565 = vmatprep.subr.bf16.mxu0 %v5574_v35  ;;  %3909 = vmatprep.subr.bf16.mxu1 %v5577_v36  ;;  %v5664_v35 = vld [vmem:[%s6620_s30 + $0x4c4] ss:$16 sps:$4 sm:$0xff]   ;;  %v5667_v36 = vld [vmem:[%s6620_s30 + $0x4cc] ss:$16 sps:$4 sm:$0xff]  }
  0xe6   : > { %3566 = vmatpush1.bf16.msra.mxu0 %v5572_v37  ;;  %3910 = vmatpush1.bf16.msra.mxu1 %v5575_v38  ;;  %v5662_v37 = vld [vmem:[%s6620_s30 + $0x4c0] ss:$16 sps:$4 sm:$0xff]   ;;  %v5665_v38 = vld [vmem:[%s6620_s30 + $0x4c8] ss:$16 sps:$4 sm:$0xff]  }
  0xe7   : > { %3567 = vmatprep.subr.bf16.mxu0 %v5580_v39  ;;  %3911 = vmatprep.subr.bf16.mxu1 %v5583_v40  ;;  %v5670_v39 = vld [vmem:[%s6620_s30 + $0x4e4] ss:$16 sps:$4 sm:$0xff]   ;;  %v5673_v40 = vld [vmem:[%s6620_s30 + $0x4ec] ss:$16 sps:$4 sm:$0xff]  }
  0xea   : > { %3568 = vmatpush1.bf16.msra.mxu0 %v5578_v41  ;;  %3912 = vmatpush1.bf16.msra.mxu1 %v5581_v42  ;;  %v5668_v41 = vld [vmem:[%s6620_s30 + $0x4e0] ss:$16 sps:$4 sm:$0xff]   ;;  %v5671_v42 = vld [vmem:[%s6620_s30 + $0x4e8] ss:$16 sps:$4 sm:$0xff]  }
  0xeb   : > { %3569 = vmatprep.subr.bf16.mxu0 %v5586_v43  ;;  %3913 = vmatprep.subr.bf16.mxu1 %v5589_v44  ;;  %v5676_v43 = vld [vmem:[%s6620_s30 + $0x504] ss:$16 sps:$4 sm:$0xff]   ;;  %v5679_v44 = vld [vmem:[%s6620_s30 + $0x50c] ss:$16 sps:$4 sm:$0xff]  }
  0xee   : > { %3570 = vmatpush1.bf16.msra.mxu0 %v5584_v45  ;;  %3914 = vmatpush1.bf16.msra.mxu1 %v5587_v46  ;;  %v5674_v45 = vld [vmem:[%s6620_s30 + $0x500] ss:$16 sps:$4 sm:$0xff]   ;;  %v5677_v46 = vld [vmem:[%s6620_s30 + $0x508] ss:$16 sps:$4 sm:$0xff]  }
  0xef   : > { %3571 = vmatprep.subr.bf16.mxu0 %v5592_v47  ;;  %3915 = vmatprep.subr.bf16.mxu1 %v5595_v48  ;;  %v5682_v47 = vld [vmem:[%s6620_s30 + $0x524] ss:$16 sps:$4 sm:$0xff]   ;;  %v5685_v48 = vld [vmem:[%s6620_s30 + $0x52c] ss:$16 sps:$4 sm:$0xff]  }
  0xf2   : > { %3572 = vmatpush1.bf16.msra.mxu0 %v5590_v49  ;;  %3916 = vmatpush1.bf16.msra.mxu1 %v5593_v50  ;;  %v5680_v49 = vld [vmem:[%s6620_s30 + $0x520] ss:$16 sps:$4 sm:$0xff]   ;;  %v5683_v50 = vld [vmem:[%s6620_s30 + $0x528] ss:$16 sps:$4 sm:$0xff]  }
  0xf3   : > { %3573 = vmatprep.subr.bf16.mxu0 %v5598_v51  ;;  %3917 = vmatprep.subr.bf16.mxu1 %v5601_v52  ;;  %v5688_v51 = vld [vmem:[%s6620_s30 + $0x544] ss:$16 sps:$4 sm:$0xff]   ;;  %v5691_v52 = vld [vmem:[%s6620_s30 + $0x54c] ss:$16 sps:$4 sm:$0xff]  }
  0xf6   : > { %3574 = vmatpush1.bf16.msra.mxu0 %v5596_v53  ;;  %3918 = vmatpush1.bf16.msra.mxu1 %v5599_v54  ;;  %v5686_v53 = vld [vmem:[%s6620_s30 + $0x540] ss:$16 sps:$4 sm:$0xff]   ;;  %v5689_v54 = vld [vmem:[%s6620_s30 + $0x548] ss:$16 sps:$4 sm:$0xff]  }
  0xf7   : > { %3575 = vmatprep.subr.bf16.mxu0 %v5604_v55  ;;  %3919 = vmatprep.subr.bf16.mxu1 %v5607_v56  ;;  %v5694_v55 = vld [vmem:[%s6620_s30 + $0x564] ss:$16 sps:$4 sm:$0xff]   ;;  %v5697_v56 = vld [vmem:[%s6620_s30 + $0x56c] ss:$16 sps:$4 sm:$0xff]  }
  0xfa   : > { %3576 = vmatpush1.bf16.msra.mxu0 %v5602_v57  ;;  %3920 = vmatpush1.bf16.msra.mxu1 %v5605_v58  ;;  %v5692_v57 = vld [vmem:[%s6620_s30 + $0x560] ss:$16 sps:$4 sm:$0xff]   ;;  %v5695_v58 = vld [vmem:[%s6620_s30 + $0x568] ss:$16 sps:$4 sm:$0xff]  }
  0xfb   : > { %3577 = vmatprep.subr.bf16.mxu0 %v5610_v59  ;;  %3921 = vmatprep.subr.bf16.mxu1 %v5613_v60  ;;  %v5700_v59 = vld [vmem:[%s6620_s30 + $0x584] ss:$16 sps:$4 sm:$0xff]   ;;  %v5703_v60 = vld [vmem:[%s6620_s30 + $0x58c] ss:$16 sps:$4 sm:$0xff]  }
  0xfe   : > { %3578 = vmatpush1.bf16.msra.mxu0 %v5608_v61  ;;  %3922 = vmatpush1.bf16.msra.mxu1 %v5611_v62  ;;  %v5698_v61 = vld [vmem:[%s6620_s30 + $0x580] ss:$16 sps:$4 sm:$0xff]   ;;  %v5701_v62 = vld [vmem:[%s6620_s30 + $0x588] ss:$16 sps:$4 sm:$0xff]  }
  0xff   : > { %3579 = vmatprep.subr.bf16.mxu0 %v5616_v63  ;;  %3923 = vmatprep.subr.bf16.mxu1 %v5619_v0  ;;  %v5706_v63 = vld [vmem:[%s6620_s30 + $0x5a4] ss:$16 sps:$4 sm:$0xff]   ;;  %v5709_v0 = vld [vmem:[%s6620_s30 + $0x5ac] ss:$16 sps:$4 sm:$0xff]  }
 0x102   : > { %3580 = vmatpush1.bf16.msra.mxu0 %v5614_v1  ;;  %3924 = vmatpush1.bf16.msra.mxu1 %v5617_v2  ;;  %v5704_v1 = vld [vmem:[%s6620_s30 + $0x5a0] ss:$16 sps:$4 sm:$0xff]   ;;  %v5707_v2 = vld [vmem:[%s6620_s30 + $0x5a8] ss:$16 sps:$4 sm:$0xff]  }
 0x103   : > { %3581 = vmatprep.subr.bf16.mxu0 %v5622_v3  ;;  %3925 = vmatprep.subr.bf16.mxu1 %v5625_v4  ;;  %v5712_v3 = vld [vmem:[%s6620_s30 + $0x5c4] ss:$16 sps:$4 sm:$0xff]   ;;  %v5715_v4 = vld [vmem:[%s6620_s30 + $0x5cc] ss:$16 sps:$4 sm:$0xff]  }
 0x106   : > { %3582 = vmatpush1.bf16.msra.mxu0 %v5620_v5  ;;  %3926 = vmatpush1.bf16.msra.mxu1 %v5623_v6  ;;  %v5710_v5 = vld [vmem:[%s6620_s30 + $0x5c0] ss:$16 sps:$4 sm:$0xff]   ;;  %v5713_v6 = vld [vmem:[%s6620_s30 + $0x5c8] ss:$16 sps:$4 sm:$0xff]  }
 0x107   : > { %3594 = vmatprep.subr.bf16.mxu0 %v5628_v7  ;;  %3938 = vmatprep.subr.bf16.mxu1 %v5631_v8  ;;  %v5718_v7 = vld [vmem:[%s6620_s30 + $0x5e4] ss:$16 sps:$4 sm:$0xff]   ;;  %v5721_v8 = vld [vmem:[%s6620_s30 + $0x5ec] ss:$16 sps:$4 sm:$0xff]  }
 0x109   : > { %3584 = vmatmul.mubr.bf16.vlgmr.msra.gmra.mrb[0].mxu0 %v4690_v9  ;;  %3928 = vmatmul.mubr.bf16.vlgmr.msra.gmra.mrb[0].mxu1 %v4690_v9  ;;  %v5716_v9 = vld [vmem:[%s6620_s30 + $0x5e0] ss:$16 sps:$4 sm:$0xff]  }
 0x10a   : > { %3595 = vmatpush1.bf16.msra.mxu0 %v5626_v10  ;;  %3939 = vmatpush1.bf16.msra.mxu1 %v5629_v11  ;;  %v5719_v10 = vld [vmem:[%s6620_s30 + $0x5e8] ss:$16 sps:$4 sm:$0xff]   ;;  %v5724_v11 = vld [vmem:[%s6620_s30 + $0x604] ss:$16 sps:$4 sm:$0xff]  }
 0x10b   : > { %3596 = vmatprep.subr.bf16.mxu0 %v5634_v12  ;;  %3940 = vmatprep.subr.bf16.mxu1 %v5637_v13  ;;  %v5727_v12 = vld [vmem:[%s6620_s30 + $0x60c] ss:$16 sps:$4 sm:$0xff]   ;;  %v5722_v13 = vld [vmem:[%s6620_s30 + $0x600] ss:$16 sps:$4 sm:$0xff]  }
 0x10c   : > { %3626 = vmatprep.mubr.bf16.mxu0 %v4693_v16  ;;  %3970 = vmatprep.mubr.bf16.mxu1 %v4693_v16  ;;  %v5725_v16 = vld [vmem:[%s6620_s30 + $0x608] ss:$16 sps:$4 sm:$0xff]  }
 0x10e   : > { %3597 = vmatpush1.bf16.msra.mxu0 %v5632_v17  ;;  %3941 = vmatpush1.bf16.msra.mxu1 %v5635_v18  ;;  %v4692_v17 = vcombine.low %v6775_v14, %v6777_v15  ;;  %v6845_v18 = vld [vmem:[#allocation2 + $0x18] sm:$0xff]  ;;  %v5728_v14 = vld [vmem:[%s6620_s30 + $0x620] ss:$16 sps:$4 sm:$0xff]  }
 0x10f   : > { %3598 = vmatprep.subr.bf16.mxu0 %v5640_v19  ;;  %3942 = vmatprep.subr.bf16.mxu1 %v5643_v20  ;;  %v6847_v19 = vld [vmem:[#allocation2 + $0x58] sm:$0xff]  ;;  %v5730_v20 = vld [vmem:[%s6620_s30 + $0x624] ss:$16 sps:$4 sm:$0xff]  }
 0x110   : > { %v5731_v15 = vld [vmem:[%s6620_s30 + $0x628] ss:$16 sps:$4 sm:$0xff]  }
 0x112   : > { %3599 = vmatpush1.bf16.msra.mxu0 %v5638_v21  ;;  %3943 = vmatpush1.bf16.msra.mxu1 %v5641_v22  ;;  %v5733_v21 = vld [vmem:[%s6620_s30 + $0x62c] ss:$16 sps:$4 sm:$0xff]   ;;  %v4695_v22 = vcombine.high %v6845_v18, %v6847_v19 }
 0x113   : > { %3600 = vmatprep.subr.bf16.mxu0 %v5646_v23  ;;  %3944 = vmatprep.subr.bf16.mxu1 %v5649_v24  ;;  %v5736_v23 = vld [vmem:[%s6620_s30 + $0x644] ss:$16 sps:$4 sm:$0xff]   ;;  %v5739_v24 = vld [vmem:[%s6620_s30 + $0x64c] ss:$16 sps:$4 sm:$0xff]  }
 0x116   : > { %3601 = vmatpush1.bf16.msra.mxu0 %v5644_v25  ;;  %3945 = vmatpush1.bf16.msra.mxu1 %v5647_v26  ;;  %v5734_v25 = vld [vmem:[%s6620_s30 + $0x640] ss:$16 sps:$4 sm:$0xff]   ;;  %v5737_v26 = vld [vmem:[%s6620_s30 + $0x648] ss:$16 sps:$4 sm:$0xff]  }
 0x117   : > { %3602 = vmatprep.subr.bf16.mxu0 %v5652_v27  ;;  %3946 = vmatprep.subr.bf16.mxu1 %v5655_v28  ;;  %v5742_v27 = vld [vmem:[%s6620_s30 + $0x664] ss:$16 sps:$4 sm:$0xff]   ;;  %v5745_v28 = vld [vmem:[%s6620_s30 + $0x66c] ss:$16 sps:$4 sm:$0xff]  }
 0x11a   : > { %3603 = vmatpush1.bf16.msra.mxu0 %v5650_v29  ;;  %3947 = vmatpush1.bf16.msra.mxu1 %v5653_v30  ;;  %v5740_v29 = vld [vmem:[%s6620_s30 + $0x660] ss:$16 sps:$4 sm:$0xff]   ;;  %v5743_v30 = vld [vmem:[%s6620_s30 + $0x668] ss:$16 sps:$4 sm:$0xff]  }
 0x11b   : > { %3604 = vmatprep.subr.bf16.mxu0 %v5658_v31  ;;  %3948 = vmatprep.subr.bf16.mxu1 %v5661_v32  ;;  %v5748_v31 = vld [vmem:[%s6620_s30 + $0x684] ss:$16 sps:$4 sm:$0xff]   ;;  %v5751_v32 = vld [vmem:[%s6620_s30 + $0x68c] ss:$16 sps:$4 sm:$0xff]  }
 0x11e   : > { %3605 = vmatpush1.bf16.msra.mxu0 %v5656_v33  ;;  %3949 = vmatpush1.bf16.msra.mxu1 %v5659_v34  ;;  %v5746_v33 = vld [vmem:[%s6620_s30 + $0x680] ss:$16 sps:$4 sm:$0xff]   ;;  %v5749_v34 = vld [vmem:[%s6620_s30 + $0x688] ss:$16 sps:$4 sm:$0xff]  }
 0x11f   : > { %3606 = vmatprep.subr.bf16.mxu0 %v5664_v35  ;;  %3950 = vmatprep.subr.bf16.mxu1 %v5667_v36  ;;  %v5754_v35 = vld [vmem:[%s6620_s30 + $0x6a4] ss:$16 sps:$4 sm:$0xff]   ;;  %v5757_v36 = vld [vmem:[%s6620_s30 + $0x6ac] ss:$16 sps:$4 sm:$0xff]  }
 0x122   : > { %3607 = vmatpush1.bf16.msra.mxu0 %v5662_v37  ;;  %3951 = vmatpush1.bf16.msra.mxu1 %v5665_v38  ;;  %v5752_v37 = vld [vmem:[%s6620_s30 + $0x6a0] ss:$16 sps:$4 sm:$0xff]   ;;  %v5755_v38 = vld [vmem:[%s6620_s30 + $0x6a8] ss:$16 sps:$4 sm:$0xff]  }
 0x123   : > { %3608 = vmatprep.subr.bf16.mxu0 %v5670_v39  ;;  %3952 = vmatprep.subr.bf16.mxu1 %v5673_v40  ;;  %v5760_v39 = vld [vmem:[%s6620_s30 + $0x6c4] ss:$16 sps:$4 sm:$0xff]   ;;  %v5763_v40 = vld [vmem:[%s6620_s30 + $0x6cc] ss:$16 sps:$4 sm:$0xff]  }
 0x126   : > { %3609 = vmatpush1.bf16.msra.mxu0 %v5668_v41  ;;  %3953 = vmatpush1.bf16.msra.mxu1 %v5671_v42  ;;  %v5758_v41 = vld [vmem:[%s6620_s30 + $0x6c0] ss:$16 sps:$4 sm:$0xff]   ;;  %v5761_v42 = vld [vmem:[%s6620_s30 + $0x6c8] ss:$16 sps:$4 sm:$0xff]  }
 0x127   : > { %3610 = vmatprep.subr.bf16.mxu0 %v5676_v43  ;;  %3954 = vmatprep.subr.bf16.mxu1 %v5679_v44  ;;  %v5766_v43 = vld [vmem:[%s6620_s30 + $0x6e4] ss:$16 sps:$4 sm:$0xff]   ;;  %v5769_v44 = vld [vmem:[%s6620_s30 + $0x6ec] ss:$16 sps:$4 sm:$0xff]  }
 0x12a   : > { %3611 = vmatpush1.bf16.msra.mxu0 %v5674_v45  ;;  %3955 = vmatpush1.bf16.msra.mxu1 %v5677_v46  ;;  %v5764_v45 = vld [vmem:[%s6620_s30 + $0x6e0] ss:$16 sps:$4 sm:$0xff]   ;;  %v5767_v46 = vld [vmem:[%s6620_s30 + $0x6e8] ss:$16 sps:$4 sm:$0xff]  }
 0x12b   : > { %3612 = vmatprep.subr.bf16.mxu0 %v5682_v47  ;;  %3956 = vmatprep.subr.bf16.mxu1 %v5685_v48  ;;  %v5772_v47 = vld [vmem:[%s6620_s30 + $0x704] ss:$16 sps:$4 sm:$0xff]   ;;  %v5775_v48 = vld [vmem:[%s6620_s30 + $0x70c] ss:$16 sps:$4 sm:$0xff]  }
 0x12e   : > { %3613 = vmatpush1.bf16.msra.mxu0 %v5680_v49  ;;  %3957 = vmatpush1.bf16.msra.mxu1 %v5683_v50  ;;  %v5770_v49 = vld [vmem:[%s6620_s30 + $0x700] ss:$16 sps:$4 sm:$0xff]   ;;  %v5773_v50 = vld [vmem:[%s6620_s30 + $0x708] ss:$16 sps:$4 sm:$0xff]  }
 0x12f   : > { %3614 = vmatprep.subr.bf16.mxu0 %v5688_v51  ;;  %3958 = vmatprep.subr.bf16.mxu1 %v5691_v52  ;;  %v5778_v51 = vld [vmem:[%s6620_s30 + $0x724] ss:$16 sps:$4 sm:$0xff]   ;;  %v5781_v52 = vld [vmem:[%s6620_s30 + $0x72c] ss:$16 sps:$4 sm:$0xff]  }
 0x132   : > { %3615 = vmatpush1.bf16.msra.mxu0 %v5686_v53  ;;  %3959 = vmatpush1.bf16.msra.mxu1 %v5689_v54  ;;  %v5776_v53 = vld [vmem:[%s6620_s30 + $0x720] ss:$16 sps:$4 sm:$0xff]   ;;  %v5779_v54 = vld [vmem:[%s6620_s30 + $0x728] ss:$16 sps:$4 sm:$0xff]  }
 0x133   : > { %3616 = vmatprep.subr.bf16.mxu0 %v5694_v55  ;;  %3960 = vmatprep.subr.bf16.mxu1 %v5697_v56  ;;  %v5784_v55 = vld [vmem:[%s6620_s30 + $0x744] ss:$16 sps:$4 sm:$0xff]   ;;  %v5787_v56 = vld [vmem:[%s6620_s30 + $0x74c] ss:$16 sps:$4 sm:$0xff]  }
 0x136   : > { %3617 = vmatpush1.bf16.msra.mxu0 %v5692_v57  ;;  %3961 = vmatpush1.bf16.msra.mxu1 %v5695_v58  ;;  %v5782_v57 = vld [vmem:[%s6620_s30 + $0x740] ss:$16 sps:$4 sm:$0xff]   ;;  %v5785_v58 = vld [vmem:[%s6620_s30 + $0x748] ss:$16 sps:$4 sm:$0xff]  }
 0x137   : > { %3618 = vmatprep.subr.bf16.mxu0 %v5700_v59  ;;  %3962 = vmatprep.subr.bf16.mxu1 %v5703_v60  ;;  %v5790_v59 = vld [vmem:[%s6620_s30 + $0x764] ss:$16 sps:$4 sm:$0xff]   ;;  %v5793_v60 = vld [vmem:[%s6620_s30 + $0x76c] ss:$16 sps:$4 sm:$0xff]  }
 0x13a   : > { %3619 = vmatpush1.bf16.msra.mxu0 %v5698_v61  ;;  %3963 = vmatpush1.bf16.msra.mxu1 %v5701_v62  ;;  %v5788_v61 = vld [vmem:[%s6620_s30 + $0x760] ss:$16 sps:$4 sm:$0xff]   ;;  %v5791_v62 = vld [vmem:[%s6620_s30 + $0x768] ss:$16 sps:$4 sm:$0xff]  }
 0x13b   : > { %3620 = vmatprep.subr.bf16.mxu0 %v5706_v63  ;;  %3964 = vmatprep.subr.bf16.mxu1 %v5709_v0  ;;  %v5796_v63 = vld [vmem:[%s6620_s30 + $0x784] ss:$16 sps:$4 sm:$0xff]   ;;  %v5799_v0 = vld [vmem:[%s6620_s30 + $0x78c] ss:$16 sps:$4 sm:$0xff]  }
 0x13e   : > { %3621 = vmatpush1.bf16.msra.mxu0 %v5704_v1  ;;  %3965 = vmatpush1.bf16.msra.mxu1 %v5707_v2  ;;  %v5794_v1 = vld [vmem:[%s6620_s30 + $0x780] ss:$16 sps:$4 sm:$0xff]   ;;  %v5797_v2 = vld [vmem:[%s6620_s30 + $0x788] ss:$16 sps:$4 sm:$0xff]  }
 0x13f   : > { %3622 = vmatprep.subr.bf16.mxu0 %v5712_v3  ;;  %3966 = vmatprep.subr.bf16.mxu1 %v5715_v4  ;;  %v5802_v3 = vld [vmem:[%s6620_s30 + $0x7a4] ss:$16 sps:$4 sm:$0xff]   ;;  %v5805_v4 = vld [vmem:[%s6620_s30 + $0x7ac] ss:$16 sps:$4 sm:$0xff]  }
 0x142   : > { %3623 = vmatpush1.bf16.msra.mxu0 %v5710_v5  ;;  %3967 = vmatpush1.bf16.msra.mxu1 %v5713_v6  ;;  %v5800_v5 = vld [vmem:[%s6620_s30 + $0x7a0] ss:$16 sps:$4 sm:$0xff]   ;;  %v5803_v6 = vld [vmem:[%s6620_s30 + $0x7a8] ss:$16 sps:$4 sm:$0xff]  }
 0x143   : > { %3624 = vmatprep.subr.bf16.mxu0 %v5718_v7  ;;  %3968 = vmatprep.subr.bf16.mxu1 %v5721_v8  ;;  %v5808_v7 = vld [vmem:[%s6620_s30 + $0x7c4] ss:$16 sps:$4 sm:$0xff]   ;;  %v5811_v8 = vld [vmem:[%s6620_s30 + $0x7cc] ss:$16 sps:$4 sm:$0xff]  }
 0x146   : > { %3625 = vmatpush1.bf16.msra.mxu0 %v5716_v9  ;;  %3969 = vmatpush1.bf16.msra.mxu1 %v5719_v10  ;;  %v5806_v9 = vld [vmem:[%s6620_s30 + $0x7c0] ss:$16 sps:$4 sm:$0xff]   ;;  %v5809_v10 = vld [vmem:[%s6620_s30 + $0x7c8] ss:$16 sps:$4 sm:$0xff]  }
 0x147   : > { %3637 = vmatprep.subr.bf16.mxu0 %v5724_v11  ;;  %3981 = vmatprep.subr.bf16.mxu1 %v5727_v12  ;;  %v5814_v11 = vld [vmem:[%s6620_s30 + $0x7e4] ss:$16 sps:$4 sm:$0xff]   ;;  %v5817_v12 = vld [vmem:[%s6620_s30 + $0x7ec] ss:$16 sps:$4 sm:$0xff]  }
 0x149   : > { %3627 = vmatmul.mubr.bf16.vlgmr.msra.gmra.mrb[0].mxu0 %v4692_v17  ;;  %3971 = vmatmul.mubr.bf16.vlgmr.msra.gmra.mrb[0].mxu1 %v4692_v17  ;;  %v5820_v17 = vld [vmem:[%s6620_s30 + $0x804] ss:$16 sps:$4 sm:$0xff]  }
 0x14a   : > { %3638 = vmatpush1.bf16.msra.mxu0 %v5722_v13  ;;  %3982 = vmatpush1.bf16.msra.mxu1 %v5725_v16  ;;  %v5812_v13 = vld [vmem:[%s6620_s30 + $0x7e0] ss:$16 sps:$4 sm:$0xff]   ;;  %v5815_v16 = vld [vmem:[%s6620_s30 + $0x7e8] ss:$16 sps:$4 sm:$0xff]  }
 0x14b   : > { %3639 = vmatprep.subr.bf16.mxu0 %v5730_v20  ;;  %3983 = vmatprep.subr.bf16.mxu1 %v5733_v21  ;;  %v5823_v20 = vld [vmem:[%s6620_s30 + $0x80c] ss:$16 sps:$4 sm:$0xff]   ;;  %v6913_v21 = vld [vmem:[#allocation2 + $0x20] sm:$0xff] }
 0x14c   : > { %3669 = vmatprep.mubr.bf16.mxu0 %v4695_v22  ;;  %4013 = vmatprep.mubr.bf16.mxu1 %v4695_v22  ;;  %v4694_v22 = vcombine.low %v6845_v18, %v6847_v19  ;;  %v5824_v18 = vld [vmem:[%s6620_s30 + $0x820] ss:$16 sps:$4 sm:$0xff]   ;;  %v5827_v19 = vld [vmem:[%s6620_s30 + $0x828] ss:$16 sps:$4 sm:$0xff]  }
 0x14e   : > { %3640 = vmatpush1.bf16.msra.mxu0 %v5728_v14  ;;  %3984 = vmatpush1.bf16.msra.mxu1 %v5731_v15  ;;  %v6917_v14 = vld [vmem:[#allocation2 + $0x60] sm:$0xff] }
 0x14f   : > { %3641 = vmatprep.subr.bf16.mxu0 %v5736_v23  ;;  %3985 = vmatprep.subr.bf16.mxu1 %v5739_v24  ;;  %v5818_v15 = vld [vmem:[%s6620_s30 + $0x800] ss:$16 sps:$4 sm:$0xff]   ;;  %v5821_v23 = vld [vmem:[%s6620_s30 + $0x808] ss:$16 sps:$4 sm:$0xff]   ;;  %v5826_v24 = vld [vmem:[%s6620_s30 + $0x824] ss:$16 sps:$4 sm:$0xff]  }
 0x152   : > { %3642 = vmatpush1.bf16.msra.mxu0 %v5734_v25  ;;  %3986 = vmatpush1.bf16.msra.mxu1 %v5737_v26  ;;  %v5829_v25 = vld [vmem:[%s6620_s30 + $0x82c] ss:$16 sps:$4 sm:$0xff]   ;;  %v4697_v26 = vcombine.high %v6913_v21, %v6917_v14 }
 0x153   : > { %3643 = vmatprep.subr.bf16.mxu0 %v5742_v27  ;;  %3987 = vmatprep.subr.bf16.mxu1 %v5745_v28  ;;  %v5832_v27 = vld [vmem:[%s6620_s30 + $0x844] ss:$16 sps:$4 sm:$0xff]   ;;  %v5835_v28 = vld [vmem:[%s6620_s30 + $0x84c] ss:$16 sps:$4 sm:$0xff]  }
 0x156   : > { %3644 = vmatpush1.bf16.msra.mxu0 %v5740_v29  ;;  %3988 = vmatpush1.bf16.msra.mxu1 %v5743_v30  ;;  %v5830_v29 = vld [vmem:[%s6620_s30 + $0x840] ss:$16 sps:$4 sm:$0xff]   ;;  %v5833_v30 = vld [vmem:[%s6620_s30 + $0x848] ss:$16 sps:$4 sm:$0xff]  }
 0x157   : > { %3645 = vmatprep.subr.bf16.mxu0 %v5748_v31  ;;  %3989 = vmatprep.subr.bf16.mxu1 %v5751_v32  ;;  %v5838_v31 = vld [vmem:[%s6620_s30 + $0x864] ss:$16 sps:$4 sm:$0xff]   ;;  %v5841_v32 = vld [vmem:[%s6620_s30 + $0x86c] ss:$16 sps:$4 sm:$0xff]  }
 0x15a   : > { %3646 = vmatpush1.bf16.msra.mxu0 %v5746_v33  ;;  %3990 = vmatpush1.bf16.msra.mxu1 %v5749_v34  ;;  %v5836_v33 = vld [vmem:[%s6620_s30 + $0x860] ss:$16 sps:$4 sm:$0xff]   ;;  %v5839_v34 = vld [vmem:[%s6620_s30 + $0x868] ss:$16 sps:$4 sm:$0xff]  }
 0x15b   : > { %3647 = vmatprep.subr.bf16.mxu0 %v5754_v35  ;;  %3991 = vmatprep.subr.bf16.mxu1 %v5757_v36  ;;  %v5844_v35 = vld [vmem:[%s6620_s30 + $0x884] ss:$16 sps:$4 sm:$0xff]   ;;  %v5847_v36 = vld [vmem:[%s6620_s30 + $0x88c] ss:$16 sps:$4 sm:$0xff]  }
 0x15e   : > { %3648 = vmatpush1.bf16.msra.mxu0 %v5752_v37  ;;  %3992 = vmatpush1.bf16.msra.mxu1 %v5755_v38  ;;  %v5842_v37 = vld [vmem:[%s6620_s30 + $0x880] ss:$16 sps:$4 sm:$0xff]   ;;  %v5845_v38 = vld [vmem:[%s6620_s30 + $0x888] ss:$16 sps:$4 sm:$0xff]  }
 0x15f   : > { %3649 = vmatprep.subr.bf16.mxu0 %v5760_v39  ;;  %3993 = vmatprep.subr.bf16.mxu1 %v5763_v40  ;;  %v5850_v39 = vld [vmem:[%s6620_s30 + $0x8a4] ss:$16 sps:$4 sm:$0xff]   ;;  %v5853_v40 = vld [vmem:[%s6620_s30 + $0x8ac] ss:$16 sps:$4 sm:$0xff]  }
 0x162   : > { %3650 = vmatpush1.bf16.msra.mxu0 %v5758_v41  ;;  %3994 = vmatpush1.bf16.msra.mxu1 %v5761_v42  ;;  %v5848_v41 = vld [vmem:[%s6620_s30 + $0x8a0] ss:$16 sps:$4 sm:$0xff]   ;;  %v5851_v42 = vld [vmem:[%s6620_s30 + $0x8a8] ss:$16 sps:$4 sm:$0xff]  }
 0x163   : > { %3651 = vmatprep.subr.bf16.mxu0 %v5766_v43  ;;  %3995 = vmatprep.subr.bf16.mxu1 %v5769_v44  ;;  %v5856_v43 = vld [vmem:[%s6620_s30 + $0x8c4] ss:$16 sps:$4 sm:$0xff]   ;;  %v5859_v44 = vld [vmem:[%s6620_s30 + $0x8cc] ss:$16 sps:$4 sm:$0xff]  }
 0x166   : > { %3652 = vmatpush1.bf16.msra.mxu0 %v5764_v45  ;;  %3996 = vmatpush1.bf16.msra.mxu1 %v5767_v46  ;;  %v5854_v45 = vld [vmem:[%s6620_s30 + $0x8c0] ss:$16 sps:$4 sm:$0xff]   ;;  %v5857_v46 = vld [vmem:[%s6620_s30 + $0x8c8] ss:$16 sps:$4 sm:$0xff]  }
 0x167   : > { %3653 = vmatprep.subr.bf16.mxu0 %v5772_v47  ;;  %3997 = vmatprep.subr.bf16.mxu1 %v5775_v48  ;;  %v5862_v47 = vld [vmem:[%s6620_s30 + $0x8e4] ss:$16 sps:$4 sm:$0xff]   ;;  %v5865_v48 = vld [vmem:[%s6620_s30 + $0x8ec] ss:$16 sps:$4 sm:$0xff]  }
 0x16a   : > { %3654 = vmatpush1.bf16.msra.mxu0 %v5770_v49  ;;  %3998 = vmatpush1.bf16.msra.mxu1 %v5773_v50  ;;  %v5860_v49 = vld [vmem:[%s6620_s30 + $0x8e0] ss:$16 sps:$4 sm:$0xff]   ;;  %v5863_v50 = vld [vmem:[%s6620_s30 + $0x8e8] ss:$16 sps:$4 sm:$0xff]  }
 0x16b   : > { %3655 = vmatprep.subr.bf16.mxu0 %v5778_v51  ;;  %3999 = vmatprep.subr.bf16.mxu1 %v5781_v52  ;;  %v5868_v51 = vld [vmem:[%s6620_s30 + $0x904] ss:$16 sps:$4 sm:$0xff]   ;;  %v5871_v52 = vld [vmem:[%s6620_s30 + $0x90c] ss:$16 sps:$4 sm:$0xff]  }
 0x16e   : > { %3656 = vmatpush1.bf16.msra.mxu0 %v5776_v53  ;;  %4000 = vmatpush1.bf16.msra.mxu1 %v5779_v54  ;;  %v5866_v53 = vld [vmem:[%s6620_s30 + $0x900] ss:$16 sps:$4 sm:$0xff]   ;;  %v5869_v54 = vld [vmem:[%s6620_s30 + $0x908] ss:$16 sps:$4 sm:$0xff]  }
 0x16f   : > { %3657 = vmatprep.subr.bf16.mxu0 %v5784_v55  ;;  %4001 = vmatprep.subr.bf16.mxu1 %v5787_v56  ;;  %v5874_v55 = vld [vmem:[%s6620_s30 + $0x924] ss:$16 sps:$4 sm:$0xff]   ;;  %v5877_v56 = vld [vmem:[%s6620_s30 + $0x92c] ss:$16 sps:$4 sm:$0xff]  }
 0x172   : > { %3658 = vmatpush1.bf16.msra.mxu0 %v5782_v57  ;;  %4002 = vmatpush1.bf16.msra.mxu1 %v5785_v58  ;;  %v5872_v57 = vld [vmem:[%s6620_s30 + $0x920] ss:$16 sps:$4 sm:$0xff]   ;;  %v5875_v58 = vld [vmem:[%s6620_s30 + $0x928] ss:$16 sps:$4 sm:$0xff]  }
 0x173   : > { %3659 = vmatprep.subr.bf16.mxu0 %v5790_v59  ;;  %4003 = vmatprep.subr.bf16.mxu1 %v5793_v60  ;;  %v5880_v59 = vld [vmem:[%s6620_s30 + $0x944] ss:$16 sps:$4 sm:$0xff]   ;;  %v5883_v60 = vld [vmem:[%s6620_s30 + $0x94c] ss:$16 sps:$4 sm:$0xff]  }
 0x176   : > { %3660 = vmatpush1.bf16.msra.mxu0 %v5788_v61  ;;  %4004 = vmatpush1.bf16.msra.mxu1 %v5791_v62  ;;  %v5878_v61 = vld [vmem:[%s6620_s30 + $0x940] ss:$16 sps:$4 sm:$0xff]   ;;  %v5881_v62 = vld [vmem:[%s6620_s30 + $0x948] ss:$16 sps:$4 sm:$0xff]  }
 0x177   : > { %3661 = vmatprep.subr.bf16.mxu0 %v5796_v63  ;;  %4005 = vmatprep.subr.bf16.mxu1 %v5799_v0  ;;  %v5886_v63 = vld [vmem:[%s6620_s30 + $0x964] ss:$16 sps:$4 sm:$0xff]   ;;  %v5889_v0 = vld [vmem:[%s6620_s30 + $0x96c] ss:$16 sps:$4 sm:$0xff]  }
 0x17a   : > { %3662 = vmatpush1.bf16.msra.mxu0 %v5794_v1  ;;  %4006 = vmatpush1.bf16.msra.mxu1 %v5797_v2  ;;  %v5884_v1 = vld [vmem:[%s6620_s30 + $0x960] ss:$16 sps:$4 sm:$0xff]   ;;  %v5887_v2 = vld [vmem:[%s6620_s30 + $0x968] ss:$16 sps:$4 sm:$0xff]  }
 0x17b   : > { %3663 = vmatprep.subr.bf16.mxu0 %v5802_v3  ;;  %4007 = vmatprep.subr.bf16.mxu1 %v5805_v4  ;;  %v5892_v3 = vld [vmem:[%s6620_s30 + $0x984] ss:$16 sps:$4 sm:$0xff]   ;;  %v5895_v4 = vld [vmem:[%s6620_s30 + $0x98c] ss:$16 sps:$4 sm:$0xff]  }
 0x17e   : > { %3664 = vmatpush1.bf16.msra.mxu0 %v5800_v5  ;;  %4008 = vmatpush1.bf16.msra.mxu1 %v5803_v6  ;;  %v5890_v5 = vld [vmem:[%s6620_s30 + $0x980] ss:$16 sps:$4 sm:$0xff]   ;;  %v5893_v6 = vld [vmem:[%s6620_s30 + $0x988] ss:$16 sps:$4 sm:$0xff]  }
 0x17f   : > { %3665 = vmatprep.subr.bf16.mxu0 %v5808_v7  ;;  %4009 = vmatprep.subr.bf16.mxu1 %v5811_v8  ;;  %v5898_v7 = vld [vmem:[%s6620_s30 + $0x9a4] ss:$16 sps:$4 sm:$0xff]   ;;  %v5901_v8 = vld [vmem:[%s6620_s30 + $0x9ac] ss:$16 sps:$4 sm:$0xff]  }
 0x182   : > { %3666 = vmatpush1.bf16.msra.mxu0 %v5806_v9  ;;  %4010 = vmatpush1.bf16.msra.mxu1 %v5809_v10  ;;  %v5896_v9 = vld [vmem:[%s6620_s30 + $0x9a0] ss:$16 sps:$4 sm:$0xff]   ;;  %v5899_v10 = vld [vmem:[%s6620_s30 + $0x9a8] ss:$16 sps:$4 sm:$0xff]  }
 0x183   : > { %3667 = vmatprep.subr.bf16.mxu0 %v5814_v11  ;;  %4011 = vmatprep.subr.bf16.mxu1 %v5817_v12  ;;  %v5904_v11 = vld [vmem:[%s6620_s30 + $0x9c4] ss:$16 sps:$4 sm:$0xff]   ;;  %v5907_v12 = vld [vmem:[%s6620_s30 + $0x9cc] ss:$16 sps:$4 sm:$0xff]  }
 0x186   : > { %3668 = vmatpush1.bf16.msra.mxu0 %v5812_v13  ;;  %4012 = vmatpush1.bf16.msra.mxu1 %v5815_v16  ;;  %v5902_v13 = vld [vmem:[%s6620_s30 + $0x9c0] ss:$16 sps:$4 sm:$0xff]   ;;  %v5905_v16 = vld [vmem:[%s6620_s30 + $0x9c8] ss:$16 sps:$4 sm:$0xff]  }
 0x187   : > { %3680 = vmatprep.subr.bf16.mxu0 %v5820_v17  ;;  %4024 = vmatprep.subr.bf16.mxu1 %v5823_v20  ;;  %v5910_v17 = vld [vmem:[%s6620_s30 + $0x9e4] ss:$16 sps:$4 sm:$0xff]   ;;  %v5913_v20 = vld [vmem:[%s6620_s30 + $0x9ec] ss:$16 sps:$4 sm:$0xff]  }
 0x189   : > { %3670 = vmatmul.mubr.bf16.vlgmr.msra.gmra.mrb[0].mxu0 %v4694_v22  ;;  %4014 = vmatmul.mubr.bf16.vlgmr.msra.gmra.mrb[0].mxu1 %v4694_v22  ;;  %v5908_v22 = vld [vmem:[%s6620_s30 + $0x9e0] ss:$16 sps:$4 sm:$0xff]  }
 0x18a   : > { %3681 = vmatpush1.bf16.msra.mxu0 %v5818_v15  ;;  %4025 = vmatpush1.bf16.msra.mxu1 %v5821_v23  ;;  %v5911_v15 = vld [vmem:[%s6620_s30 + $0x9e8] ss:$16 sps:$4 sm:$0xff]   ;;  %v5916_v23 = vld [vmem:[%s6620_s30 + $0xa04] ss:$16 sps:$4 sm:$0xff]  }
 0x18b   : > { %3682 = vmatprep.subr.bf16.mxu0 %v5826_v24  ;;  %4026 = vmatprep.subr.bf16.mxu1 %v5829_v25  ;;  %v5919_v24 = vld [vmem:[%s6620_s30 + $0xa0c] ss:$16 sps:$4 sm:$0xff]  }
 0x18c   : > { %3712 = vmatprep.mubr.bf16.mxu0 %v4697_v26  ;;  %4056 = vmatprep.mubr.bf16.mxu1 %v4697_v26  ;;  %v6985_v25 = vld [vmem:[#allocation2 + $0x28] sm:$0xff] }
 0x18d   : > { %v6987_v26 = vld [vmem:[#allocation2 + $0x68] sm:$0xff] }
 0x18e   : > { %3683 = vmatpush1.bf16.msra.mxu0 %v5824_v18  ;;  %4027 = vmatpush1.bf16.msra.mxu1 %v5827_v19  ;;  %v4696_v18 = vcombine.low %v6913_v21, %v6917_v14  ;;  %v5914_v19 = vld [vmem:[%s6620_s30 + $0xa00] ss:$16 sps:$4 sm:$0xff]   ;;  %v5923_v14 = vld [vmem:[%s6620_s30 + $0xa28] ss:$16 sps:$4 sm:$0xff]  }
 0x18f   : > { %3684 = vmatprep.subr.bf16.mxu0 %v5832_v27  ;;  %4028 = vmatprep.subr.bf16.mxu1 %v5835_v28  ;;  %v5917_v27 = vld [vmem:[%s6620_s30 + $0xa08] ss:$16 sps:$4 sm:$0xff]   ;;  %v5922_v28 = vld [vmem:[%s6620_s30 + $0xa24] ss:$16 sps:$4 sm:$0xff]   ;;  %v5920_v21 = vld [vmem:[%s6620_s30 + $0xa20] ss:$16 sps:$4 sm:$0xff]  }
 0x192   : > { %3685 = vmatpush1.bf16.msra.mxu0 %v5830_v29  ;;  %4029 = vmatpush1.bf16.msra.mxu1 %v5833_v30  ;;  %v5925_v29 = vld [vmem:[%s6620_s30 + $0xa2c] ss:$16 sps:$4 sm:$0xff]   ;;  %v4699_v30 = vcombine.high %v6985_v25, %v6987_v26 }
 0x193   : > { %3686 = vmatprep.subr.bf16.mxu0 %v5838_v31  ;;  %4030 = vmatprep.subr.bf16.mxu1 %v5841_v32  ;;  %v5928_v31 = vld [vmem:[%s6620_s30 + $0xa44] ss:$16 sps:$4 sm:$0xff]   ;;  %v5931_v32 = vld [vmem:[%s6620_s30 + $0xa4c] ss:$16 sps:$4 sm:$0xff]  }
 0x196   : > { %3687 = vmatpush1.bf16.msra.mxu0 %v5836_v33  ;;  %4031 = vmatpush1.bf16.msra.mxu1 %v5839_v34  ;;  %v5926_v33 = vld [vmem:[%s6620_s30 + $0xa40] ss:$16 sps:$4 sm:$0xff]   ;;  %v5929_v34 = vld [vmem:[%s6620_s30 + $0xa48] ss:$16 sps:$4 sm:$0xff]  }
 0x197   : > { %3688 = vmatprep.subr.bf16.mxu0 %v5844_v35  ;;  %4032 = vmatprep.subr.bf16.mxu1 %v5847_v36  ;;  %v5934_v35 = vld [vmem:[%s6620_s30 + $0xa64] ss:$16 sps:$4 sm:$0xff]   ;;  %v5937_v36 = vld [vmem:[%s6620_s30 + $0xa6c] ss:$16 sps:$4 sm:$0xff]  }
 0x19a   : > { %3689 = vmatpush1.bf16.msra.mxu0 %v5842_v37  ;;  %4033 = vmatpush1.bf16.msra.mxu1 %v5845_v38  ;;  %v5932_v37 = vld [vmem:[%s6620_s30 + $0xa60] ss:$16 sps:$4 sm:$0xff]   ;;  %v5935_v38 = vld [vmem:[%s6620_s30 + $0xa68] ss:$16 sps:$4 sm:$0xff]  }
 0x19b   : > { %3690 = vmatprep.subr.bf16.mxu0 %v5850_v39  ;;  %4034 = vmatprep.subr.bf16.mxu1 %v5853_v40  ;;  %v5940_v39 = vld [vmem:[%s6620_s30 + $0xa84] ss:$16 sps:$4 sm:$0xff]   ;;  %v5943_v40 = vld [vmem:[%s6620_s30 + $0xa8c] ss:$16 sps:$4 sm:$0xff]  }
 0x19e   : > { %3691 = vmatpush1.bf16.msra.mxu0 %v5848_v41  ;;  %4035 = vmatpush1.bf16.msra.mxu1 %v5851_v42  ;;  %v5938_v41 = vld [vmem:[%s6620_s30 + $0xa80] ss:$16 sps:$4 sm:$0xff]   ;;  %v5941_v42 = vld [vmem:[%s6620_s30 + $0xa88] ss:$16 sps:$4 sm:$0xff]  }
 0x19f   : > { %3692 = vmatprep.subr.bf16.mxu0 %v5856_v43  ;;  %4036 = vmatprep.subr.bf16.mxu1 %v5859_v44  ;;  %v5946_v43 = vld [vmem:[%s6620_s30 + $0xaa4] ss:$16 sps:$4 sm:$0xff]   ;;  %v5949_v44 = vld [vmem:[%s6620_s30 + $0xaac] ss:$16 sps:$4 sm:$0xff]  }
 0x1a2   : > { %3693 = vmatpush1.bf16.msra.mxu0 %v5854_v45  ;;  %4037 = vmatpush1.bf16.msra.mxu1 %v5857_v46  ;;  %v5944_v45 = vld [vmem:[%s6620_s30 + $0xaa0] ss:$16 sps:$4 sm:$0xff]   ;;  %v5947_v46 = vld [vmem:[%s6620_s30 + $0xaa8] ss:$16 sps:$4 sm:$0xff]  }
 0x1a3   : > { %3694 = vmatprep.subr.bf16.mxu0 %v5862_v47  ;;  %4038 = vmatprep.subr.bf16.mxu1 %v5865_v48  ;;  %v5952_v47 = vld [vmem:[%s6620_s30 + $0xac4] ss:$16 sps:$4 sm:$0xff]   ;;  %v5955_v48 = vld [vmem:[%s6620_s30 + $0xacc] ss:$16 sps:$4 sm:$0xff]  }
 0x1a6   : > { %3695 = vmatpush1.bf16.msra.mxu0 %v5860_v49  ;;  %4039 = vmatpush1.bf16.msra.mxu1 %v5863_v50  ;;  %v5950_v49 = vld [vmem:[%s6620_s30 + $0xac0] ss:$16 sps:$4 sm:$0xff]   ;;  %v5953_v50 = vld [vmem:[%s6620_s30 + $0xac8] ss:$16 sps:$4 sm:$0xff]  }
 0x1a7   : > { %3696 = vmatprep.subr.bf16.mxu0 %v5868_v51  ;;  %4040 = vmatprep.subr.bf16.mxu1 %v5871_v52  ;;  %v5958_v51 = vld [vmem:[%s6620_s30 + $0xae4] ss:$16 sps:$4 sm:$0xff]   ;;  %v5961_v52 = vld [vmem:[%s6620_s30 + $0xaec] ss:$16 sps:$4 sm:$0xff]  }
 0x1aa   : > { %3697 = vmatpush1.bf16.msra.mxu0 %v5866_v53  ;;  %4041 = vmatpush1.bf16.msra.mxu1 %v5869_v54  ;;  %v5956_v53 = vld [vmem:[%s6620_s30 + $0xae0] ss:$16 sps:$4 sm:$0xff]   ;;  %v5959_v54 = vld [vmem:[%s6620_s30 + $0xae8] ss:$16 sps:$4 sm:$0xff]  }
 0x1ab   : > { %3698 = vmatprep.subr.bf16.mxu0 %v5874_v55  ;;  %4042 = vmatprep.subr.bf16.mxu1 %v5877_v56  ;;  %v5964_v55 = vld [vmem:[%s6620_s30 + $0xb04] ss:$16 sps:$4 sm:$0xff]   ;;  %v5967_v56 = vld [vmem:[%s6620_s30 + $0xb0c] ss:$16 sps:$4 sm:$0xff]  }
 0x1ae   : > { %3699 = vmatpush1.bf16.msra.mxu0 %v5872_v57  ;;  %4043 = vmatpush1.bf16.msra.mxu1 %v5875_v58  ;;  %v5962_v57 = vld [vmem:[%s6620_s30 + $0xb00] ss:$16 sps:$4 sm:$0xff]   ;;  %v5965_v58 = vld [vmem:[%s6620_s30 + $0xb08] ss:$16 sps:$4 sm:$0xff]  }
 0x1af   : > { %3700 = vmatprep.subr.bf16.mxu0 %v5880_v59  ;;  %4044 = vmatprep.subr.bf16.mxu1 %v5883_v60  ;;  %v5970_v59 = vld [vmem:[%s6620_s30 + $0xb24] ss:$16 sps:$4 sm:$0xff]   ;;  %v5973_v60 = vld [vmem:[%s6620_s30 + $0xb2c] ss:$16 sps:$4 sm:$0xff]  }
 0x1b2   : > { %3701 = vmatpush1.bf16.msra.mxu0 %v5878_v61  ;;  %4045 = vmatpush1.bf16.msra.mxu1 %v5881_v62  ;;  %v5968_v61 = vld [vmem:[%s6620_s30 + $0xb20] ss:$16 sps:$4 sm:$0xff]   ;;  %v5971_v62 = vld [vmem:[%s6620_s30 + $0xb28] ss:$16 sps:$4 sm:$0xff]  }
 0x1b3   : > { %3702 = vmatprep.subr.bf16.mxu0 %v5886_v63  ;;  %4046 = vmatprep.subr.bf16.mxu1 %v5889_v0  ;;  %v5976_v63 = vld [vmem:[%s6620_s30 + $0xb44] ss:$16 sps:$4 sm:$0xff]   ;;  %v5979_v0 = vld [vmem:[%s6620_s30 + $0xb4c] ss:$16 sps:$4 sm:$0xff]  }
 0x1b6   : > { %3703 = vmatpush1.bf16.msra.mxu0 %v5884_v1  ;;  %4047 = vmatpush1.bf16.msra.mxu1 %v5887_v2  ;;  %v5974_v1 = vld [vmem:[%s6620_s30 + $0xb40] ss:$16 sps:$4 sm:$0xff]   ;;  %v5977_v2 = vld [vmem:[%s6620_s30 + $0xb48] ss:$16 sps:$4 sm:$0xff]  }
 0x1b7   : > { %3704 = vmatprep.subr.bf16.mxu0 %v5892_v3  ;;  %4048 = vmatprep.subr.bf16.mxu1 %v5895_v4  ;;  %v5982_v3 = vld [vmem:[%s6620_s30 + $0xb64] ss:$16 sps:$4 sm:$0xff]   ;;  %v5985_v4 = vld [vmem:[%s6620_s30 + $0xb6c] ss:$16 sps:$4 sm:$0xff]  }
 0x1ba   : > { %3705 = vmatpush1.bf16.msra.mxu0 %v5890_v5  ;;  %4049 = vmatpush1.bf16.msra.mxu1 %v5893_v6  ;;  %v5980_v5 = vld [vmem:[%s6620_s30 + $0xb60] ss:$16 sps:$4 sm:$0xff]   ;;  %v5983_v6 = vld [vmem:[%s6620_s30 + $0xb68] ss:$16 sps:$4 sm:$0xff]  }
 0x1bb   : > { %3706 = vmatprep.subr.bf16.mxu0 %v5898_v7  ;;  %4050 = vmatprep.subr.bf16.mxu1 %v5901_v8  ;;  %v5988_v7 = vld [vmem:[%s6620_s30 + $0xb84] ss:$16 sps:$4 sm:$0xff]   ;;  %v5991_v8 = vld [vmem:[%s6620_s30 + $0xb8c] ss:$16 sps:$4 sm:$0xff]  }
 0x1be   : > { %3707 = vmatpush1.bf16.msra.mxu0 %v5896_v9  ;;  %4051 = vmatpush1.bf16.msra.mxu1 %v5899_v10  ;;  %v5986_v9 = vld [vmem:[%s6620_s30 + $0xb80] ss:$16 sps:$4 sm:$0xff]   ;;  %v5989_v10 = vld [vmem:[%s6620_s30 + $0xb88] ss:$16 sps:$4 sm:$0xff]  }
 0x1bf   : > { %3708 = vmatprep.subr.bf16.mxu0 %v5904_v11  ;;  %4052 = vmatprep.subr.bf16.mxu1 %v5907_v12  ;;  %v5994_v11 = vld [vmem:[%s6620_s30 + $0xba4] ss:$16 sps:$4 sm:$0xff]   ;;  %v5997_v12 = vld [vmem:[%s6620_s30 + $0xbac] ss:$16 sps:$4 sm:$0xff]  }
 0x1c2   : > { %3709 = vmatpush1.bf16.msra.mxu0 %v5902_v13  ;;  %4053 = vmatpush1.bf16.msra.mxu1 %v5905_v16  ;;  %v5992_v13 = vld [vmem:[%s6620_s30 + $0xba0] ss:$16 sps:$4 sm:$0xff]   ;;  %v5995_v16 = vld [vmem:[%s6620_s30 + $0xba8] ss:$16 sps:$4 sm:$0xff]  }
 0x1c3   : > { %3710 = vmatprep.subr.bf16.mxu0 %v5910_v17  ;;  %4054 = vmatprep.subr.bf16.mxu1 %v5913_v20  ;;  %v6000_v17 = vld [vmem:[%s6620_s30 + $0xbc4] ss:$16 sps:$4 sm:$0xff]   ;;  %v6003_v20 = vld [vmem:[%s6620_s30 + $0xbcc] ss:$16 sps:$4 sm:$0xff]  }
 0x1c6   : > { %3711 = vmatpush1.bf16.msra.mxu0 %v5908_v22  ;;  %4055 = vmatpush1.bf16.msra.mxu1 %v5911_v15  ;;  %v5998_v22 = vld [vmem:[%s6620_s30 + $0xbc0] ss:$16 sps:$4 sm:$0xff]   ;;  %v6001_v15 = vld [vmem:[%s6620_s30 + $0xbc8] ss:$16 sps:$4 sm:$0xff]  }
 0x1c7   : > { %3723 = vmatprep.subr.bf16.mxu0 %v5916_v23  ;;  %4067 = vmatprep.subr.bf16.mxu1 %v5919_v24  ;;  %v6006_v23 = vld [vmem:[%s6620_s30 + $0xbe4] ss:$16 sps:$4 sm:$0xff]   ;;  %v6009_v24 = vld [vmem:[%s6620_s30 + $0xbec] ss:$16 sps:$4 sm:$0xff]  }
 0x1c9   : > { %3713 = vmatmul.mubr.bf16.vlgmr.msra.gmra.mrb[0].mxu0 %v4696_v18  ;;  %4057 = vmatmul.mubr.bf16.vlgmr.msra.gmra.mrb[0].mxu1 %v4696_v18  ;;  %v6004_v18 = vld [vmem:[%s6620_s30 + $0xbe0] ss:$16 sps:$4 sm:$0xff]  }
 0x1ca   : > { %3724 = vmatpush1.bf16.msra.mxu0 %v5914_v19  ;;  %4068 = vmatpush1.bf16.msra.mxu1 %v5917_v27  ;;  %v6007_v19 = vld [vmem:[%s6620_s30 + $0xbe8] ss:$16 sps:$4 sm:$0xff]   ;;  %v6012_v27 = vld [vmem:[%s6620_s30 + $0xc04] ss:$16 sps:$4 sm:$0xff]  }
 0x1cb   : > { %3725 = vmatprep.subr.bf16.mxu0 %v5922_v28  ;;  %4069 = vmatprep.subr.bf16.mxu1 %v5925_v29  ;;  %v6015_v28 = vld [vmem:[%s6620_s30 + $0xc0c] ss:$16 sps:$4 sm:$0xff]   ;;  %v4698_v29 = vcombine.low %v6985_v25, %v6987_v26  ;;  %v6016_v25 = vld [vmem:[%s6620_s30 + $0xc20] ss:$16 sps:$4 sm:$0xff]   ;;  %v6019_v26 = vld [vmem:[%s6620_s30 + $0xc28] ss:$16 sps:$4 sm:$0xff]  }
 0x1cc   : > { %3755 = vmatprep.mubr.bf16.mxu0 %v4699_v30  ;;  %4099 = vmatprep.mubr.bf16.mxu1 %v4699_v30  ;;  %v7059_v30 = vld [vmem:[#allocation2 + $0x30] sm:$0xff] }
 0x1ce   : > { %3726 = vmatpush1.bf16.msra.mxu0 %v5920_v21  ;;  %4070 = vmatpush1.bf16.msra.mxu1 %v5923_v14  ;;  %v7061_v21 = vld [vmem:[#allocation2 + $0x70] sm:$0xff] }
 0x1cf   : > { %3727 = vmatprep.subr.bf16.mxu0 %v5928_v31  ;;  %4071 = vmatprep.subr.bf16.mxu1 %v5931_v32  ;;  %v6010_v14 = vld [vmem:[%s6620_s30 + $0xc00] ss:$16 sps:$4 sm:$0xff]   ;;  %v6013_v31 = vld [vmem:[%s6620_s30 + $0xc08] ss:$16 sps:$4 sm:$0xff]   ;;  %v6018_v32 = vld [vmem:[%s6620_s30 + $0xc24] ss:$16 sps:$4 sm:$0xff]  }
 0x1d2   : > { %3728 = vmatpush1.bf16.msra.mxu0 %v5926_v33  ;;  %4072 = vmatpush1.bf16.msra.mxu1 %v5929_v34  ;;  %v6021_v33 = vld [vmem:[%s6620_s30 + $0xc2c] ss:$16 sps:$4 sm:$0xff]   ;;  %v4701_v34 = vcombine.high %v7059_v30, %v7061_v21 }
 0x1d3   : > { %3729 = vmatprep.subr.bf16.mxu0 %v5934_v35  ;;  %4073 = vmatprep.subr.bf16.mxu1 %v5937_v36  ;;  %v6024_v35 = vld [vmem:[%s6620_s30 + $0xc44] ss:$16 sps:$4 sm:$0xff]   ;;  %v6027_v36 = vld [vmem:[%s6620_s30 + $0xc4c] ss:$16 sps:$4 sm:$0xff]  }
 0x1d6   : > { %3730 = vmatpush1.bf16.msra.mxu0 %v5932_v37  ;;  %4074 = vmatpush1.bf16.msra.mxu1 %v5935_v38  ;;  %v6022_v37 = vld [vmem:[%s6620_s30 + $0xc40] ss:$16 sps:$4 sm:$0xff]   ;;  %v6025_v38 = vld [vmem:[%s6620_s30 + $0xc48] ss:$16 sps:$4 sm:$0xff]  }
 0x1d7   : > { %3731 = vmatprep.subr.bf16.mxu0 %v5940_v39  ;;  %4075 = vmatprep.subr.bf16.mxu1 %v5943_v40  ;;  %v6030_v39 = vld [vmem:[%s6620_s30 + $0xc64] ss:$16 sps:$4 sm:$0xff]   ;;  %v6033_v40 = vld [vmem:[%s6620_s30 + $0xc6c] ss:$16 sps:$4 sm:$0xff]  }
 0x1da   : > { %3732 = vmatpush1.bf16.msra.mxu0 %v5938_v41  ;;  %4076 = vmatpush1.bf16.msra.mxu1 %v5941_v42  ;;  %v6028_v41 = vld [vmem:[%s6620_s30 + $0xc60] ss:$16 sps:$4 sm:$0xff]   ;;  %v6031_v42 = vld [vmem:[%s6620_s30 + $0xc68] ss:$16 sps:$4 sm:$0xff]  }
 0x1db   : > { %3733 = vmatprep.subr.bf16.mxu0 %v5946_v43  ;;  %4077 = vmatprep.subr.bf16.mxu1 %v5949_v44  ;;  %v6036_v43 = vld [vmem:[%s6620_s30 + $0xc84] ss:$16 sps:$4 sm:$0xff]   ;;  %v6039_v44 = vld [vmem:[%s6620_s30 + $0xc8c] ss:$16 sps:$4 sm:$0xff]  }
 0x1de   : > { %3734 = vmatpush1.bf16.msra.mxu0 %v5944_v45  ;;  %4078 = vmatpush1.bf16.msra.mxu1 %v5947_v46  ;;  %v6034_v45 = vld [vmem:[%s6620_s30 + $0xc80] ss:$16 sps:$4 sm:$0xff]   ;;  %v6037_v46 = vld [vmem:[%s6620_s30 + $0xc88] ss:$16 sps:$4 sm:$0xff]  }
 0x1df   : > { %3735 = vmatprep.subr.bf16.mxu0 %v5952_v47  ;;  %4079 = vmatprep.subr.bf16.mxu1 %v5955_v48  ;;  %v6042_v47 = vld [vmem:[%s6620_s30 + $0xca4] ss:$16 sps:$4 sm:$0xff]   ;;  %v6045_v48 = vld [vmem:[%s6620_s30 + $0xcac] ss:$16 sps:$4 sm:$0xff]  }
 0x1e2   : > { %3736 = vmatpush1.bf16.msra.mxu0 %v5950_v49  ;;  %4080 = vmatpush1.bf16.msra.mxu1 %v5953_v50  ;;  %v6040_v49 = vld [vmem:[%s6620_s30 + $0xca0] ss:$16 sps:$4 sm:$0xff]   ;;  %v6043_v50 = vld [vmem:[%s6620_s30 + $0xca8] ss:$16 sps:$4 sm:$0xff]  }
 0x1e3   : > { %3737 = vmatprep.subr.bf16.mxu0 %v5958_v51  ;;  %4081 = vmatprep.subr.bf16.mxu1 %v5961_v52  ;;  %v6048_v51 = vld [vmem:[%s6620_s30 + $0xcc4] ss:$16 sps:$4 sm:$0xff]   ;;  %v6051_v52 = vld [vmem:[%s6620_s30 + $0xccc] ss:$16 sps:$4 sm:$0xff]  }
 0x1e6   : > { %3738 = vmatpush1.bf16.msra.mxu0 %v5956_v53  ;;  %4082 = vmatpush1.bf16.msra.mxu1 %v5959_v54  ;;  %v6046_v53 = vld [vmem:[%s6620_s30 + $0xcc0] ss:$16 sps:$4 sm:$0xff]   ;;  %v6049_v54 = vld [vmem:[%s6620_s30 + $0xcc8] ss:$16 sps:$4 sm:$0xff]  }
 0x1e7   : > { %3739 = vmatprep.subr.bf16.mxu0 %v5964_v55  ;;  %4083 = vmatprep.subr.bf16.mxu1 %v5967_v56  ;;  %v6054_v55 = vld [vmem:[%s6620_s30 + $0xce4] ss:$16 sps:$4 sm:$0xff]   ;;  %v6057_v56 = vld [vmem:[%s6620_s30 + $0xcec] ss:$16 sps:$4 sm:$0xff]  }
 0x1ea   : > { %3740 = vmatpush1.bf16.msra.mxu0 %v5962_v57  ;;  %4084 = vmatpush1.bf16.msra.mxu1 %v5965_v58  ;;  %v6052_v57 = vld [vmem:[%s6620_s30 + $0xce0] ss:$16 sps:$4 sm:$0xff]   ;;  %v6055_v58 = vld [vmem:[%s6620_s30 + $0xce8] ss:$16 sps:$4 sm:$0xff]  }
 0x1eb   : > { %3741 = vmatprep.subr.bf16.mxu0 %v5970_v59  ;;  %4085 = vmatprep.subr.bf16.mxu1 %v5973_v60  ;;  %v6060_v59 = vld [vmem:[%s6620_s30 + $0xd04] ss:$16 sps:$4 sm:$0xff]   ;;  %v6063_v60 = vld [vmem:[%s6620_s30 + $0xd0c] ss:$16 sps:$4 sm:$0xff]  }
 0x1ee   : > { %3742 = vmatpush1.bf16.msra.mxu0 %v5968_v61  ;;  %4086 = vmatpush1.bf16.msra.mxu1 %v5971_v62  ;;  %v6058_v61 = vld [vmem:[%s6620_s30 + $0xd00] ss:$16 sps:$4 sm:$0xff]   ;;  %v6061_v62 = vld [vmem:[%s6620_s30 + $0xd08] ss:$16 sps:$4 sm:$0xff]  }
 0x1ef   : > { %3743 = vmatprep.subr.bf16.mxu0 %v5976_v63  ;;  %4087 = vmatprep.subr.bf16.mxu1 %v5979_v0  ;;  %v6066_v63 = vld [vmem:[%s6620_s30 + $0xd24] ss:$16 sps:$4 sm:$0xff]   ;;  %v6069_v0 = vld [vmem:[%s6620_s30 + $0xd2c] ss:$16 sps:$4 sm:$0xff]  }
 0x1f2   : > { %3744 = vmatpush1.bf16.msra.mxu0 %v5974_v1  ;;  %4088 = vmatpush1.bf16.msra.mxu1 %v5977_v2  ;;  %v6064_v1 = vld [vmem:[%s6620_s30 + $0xd20] ss:$16 sps:$4 sm:$0xff]   ;;  %v6067_v2 = vld [vmem:[%s6620_s30 + $0xd28] ss:$16 sps:$4 sm:$0xff]  }
 0x1f3   : > { %3745 = vmatprep.subr.bf16.mxu0 %v5982_v3  ;;  %4089 = vmatprep.subr.bf16.mxu1 %v5985_v4  ;;  %v6072_v3 = vld [vmem:[%s6620_s30 + $0xd44] ss:$16 sps:$4 sm:$0xff]   ;;  %v6075_v4 = vld [vmem:[%s6620_s30 + $0xd4c] ss:$16 sps:$4 sm:$0xff]  }
 0x1f6   : > { %3746 = vmatpush1.bf16.msra.mxu0 %v5980_v5  ;;  %4090 = vmatpush1.bf16.msra.mxu1 %v5983_v6  ;;  %v6070_v5 = vld [vmem:[%s6620_s30 + $0xd40] ss:$16 sps:$4 sm:$0xff]   ;;  %v6073_v6 = vld [vmem:[%s6620_s30 + $0xd48] ss:$16 sps:$4 sm:$0xff]  }
 0x1f7   : > { %3747 = vmatprep.subr.bf16.mxu0 %v5988_v7  ;;  %4091 = vmatprep.subr.bf16.mxu1 %v5991_v8  ;;  %v6078_v7 = vld [vmem:[%s6620_s30 + $0xd64] ss:$16 sps:$4 sm:$0xff]   ;;  %v6081_v8 = vld [vmem:[%s6620_s30 + $0xd6c] ss:$16 sps:$4 sm:$0xff]  }
 0x1fa   : > { %3748 = vmatpush1.bf16.msra.mxu0 %v5986_v9  ;;  %4092 = vmatpush1.bf16.msra.mxu1 %v5989_v10  ;;  %v6076_v9 = vld [vmem:[%s6620_s30 + $0xd60] ss:$16 sps:$4 sm:$0xff]   ;;  %v6079_v10 = vld [vmem:[%s6620_s30 + $0xd68] ss:$16 sps:$4 sm:$0xff]  }
 0x1fb   : > { %3749 = vmatprep.subr.bf16.mxu0 %v5994_v11  ;;  %4093 = vmatprep.subr.bf16.mxu1 %v5997_v12  ;;  %v6084_v11 = vld [vmem:[%s6620_s30 + $0xd84] ss:$16 sps:$4 sm:$0xff]   ;;  %v6087_v12 = vld [vmem:[%s6620_s30 + $0xd8c] ss:$16 sps:$4 sm:$0xff]  }
 0x1fe   : > { %3750 = vmatpush1.bf16.msra.mxu0 %v5992_v13  ;;  %4094 = vmatpush1.bf16.msra.mxu1 %v5995_v16  ;;  %v6082_v13 = vld [vmem:[%s6620_s30 + $0xd80] ss:$16 sps:$4 sm:$0xff]   ;;  %v6085_v16 = vld [vmem:[%s6620_s30 + $0xd88] ss:$16 sps:$4 sm:$0xff]  }
 0x1ff   : > { %3751 = vmatprep.subr.bf16.mxu0 %v6000_v17  ;;  %4095 = vmatprep.subr.bf16.mxu1 %v6003_v20  ;;  %v6090_v17 = vld [vmem:[%s6620_s30 + $0xda4] ss:$16 sps:$4 sm:$0xff]   ;;  %v6093_v20 = vld [vmem:[%s6620_s30 + $0xdac] ss:$16 sps:$4 sm:$0xff]  }
 0x202   : > { %3752 = vmatpush1.bf16.msra.mxu0 %v5998_v22  ;;  %4096 = vmatpush1.bf16.msra.mxu1 %v6001_v15  ;;  %v6088_v22 = vld [vmem:[%s6620_s30 + $0xda0] ss:$16 sps:$4 sm:$0xff]   ;;  %v6091_v15 = vld [vmem:[%s6620_s30 + $0xda8] ss:$16 sps:$4 sm:$0xff]  }
 0x203   : > { %3753 = vmatprep.subr.bf16.mxu0 %v6006_v23  ;;  %4097 = vmatprep.subr.bf16.mxu1 %v6009_v24  ;;  %v6096_v23 = vld [vmem:[%s6620_s30 + $0xdc4] ss:$16 sps:$4 sm:$0xff]   ;;  %v6099_v24 = vld [vmem:[%s6620_s30 + $0xdcc] ss:$16 sps:$4 sm:$0xff]  }
 0x206   : > { %3754 = vmatpush1.bf16.msra.mxu0 %v6004_v18  ;;  %4098 = vmatpush1.bf16.msra.mxu1 %v6007_v19  ;;  %v6094_v18 = vld [vmem:[%s6620_s30 + $0xdc0] ss:$16 sps:$4 sm:$0xff]   ;;  %v6097_v19 = vld [vmem:[%s6620_s30 + $0xdc8] ss:$16 sps:$4 sm:$0xff]  }
 0x207   : > { %3766 = vmatprep.subr.bf16.mxu0 %v6012_v27  ;;  %4110 = vmatprep.subr.bf16.mxu1 %v6015_v28  ;;  %v6102_v27 = vld [vmem:[%s6620_s30 + $0xde4] ss:$16 sps:$4 sm:$0xff]   ;;  %v6105_v28 = vld [vmem:[%s6620_s30 + $0xdec] ss:$16 sps:$4 sm:$0xff]  }
 0x209   : > { %3756 = vmatmul.mubr.bf16.vlgmr.msra.gmra.mrb[0].mxu0 %v4698_v29  ;;  %4100 = vmatmul.mubr.bf16.vlgmr.msra.gmra.mrb[0].mxu1 %v4698_v29  ;;  %v6100_v29 = vld [vmem:[%s6620_s30 + $0xde0] ss:$16 sps:$4 sm:$0xff]  }
 0x20a   : > { %3767 = vmatpush1.bf16.msra.mxu0 %v6010_v14  ;;  %4111 = vmatpush1.bf16.msra.mxu1 %v6013_v31  ;;  %v6103_v14 = vld [vmem:[%s6620_s30 + $0xde8] ss:$16 sps:$4 sm:$0xff]   ;;  %v6108_v31 = vld [vmem:[%s6620_s30 + $0xe04] ss:$16 sps:$4 sm:$0xff]  }
 0x20b   : > { %3768 = vmatprep.subr.bf16.mxu0 %v6018_v32  ;;  %4112 = vmatprep.subr.bf16.mxu1 %v6021_v33  ;;  %v6111_v32 = vld [vmem:[%s6620_s30 + $0xe0c] ss:$16 sps:$4 sm:$0xff]   ;;  %v4700_v33 = vcombine.low %v7059_v30, %v7061_v21  ;;  %v6112_v21 = vld [vmem:[%s6620_s30 + $0xe20] ss:$16 sps:$4 sm:$0xff]  }
 0x20c   : > { %3798 = vmatprep.mubr.bf16.mxu0 %v4701_v34  ;;  %4142 = vmatprep.mubr.bf16.mxu1 %v4701_v34  ;;  %v7137_v34 = vld [vmem:[#allocation2 + $0x38] sm:$0xff] }
 0x20e   : > { %3769 = vmatpush1.bf16.msra.mxu0 %v6016_v25  ;;  %4113 = vmatpush1.bf16.msra.mxu1 %v6019_v26  ;;  %v7139_v25 = vld [vmem:[#allocation2 + $0x78] sm:$0xff]  ;;  %v6106_v26 = vld [vmem:[%s6620_s30 + $0xe00] ss:$16 sps:$4 sm:$0xff]  }
 0x20f   : > { %3770 = vmatprep.subr.bf16.mxu0 %v6024_v35  ;;  %4114 = vmatprep.subr.bf16.mxu1 %v6027_v36  ;;  %v6109_v35 = vld [vmem:[%s6620_s30 + $0xe08] ss:$16 sps:$4 sm:$0xff]   ;;  %v6114_v36 = vld [vmem:[%s6620_s30 + $0xe24] ss:$16 sps:$4 sm:$0xff]   ;;  %v4703_v30 = vcombine.high %v7137_v34, %v7139_v25 }
 0x212   : > { %3771 = vmatpush1.bf16.msra.mxu0 %v6022_v37  ;;  %4115 = vmatpush1.bf16.msra.mxu1 %v6025_v38  ;;  %v6117_v37 = vld [vmem:[%s6620_s30 + $0xe2c] ss:$16 sps:$4 sm:$0xff]   ;;  %v6115_v38 = vld [vmem:[%s6620_s30 + $0xe28] ss:$16 sps:$4 sm:$0xff]  }
 0x213   : > { %3772 = vmatprep.subr.bf16.mxu0 %v6030_v39  ;;  %4116 = vmatprep.subr.bf16.mxu1 %v6033_v40  ;;  %v6120_v39 = vld [vmem:[%s6620_s30 + $0xe44] ss:$16 sps:$4 sm:$0xff]   ;;  %v6123_v40 = vld [vmem:[%s6620_s30 + $0xe4c] ss:$16 sps:$4 sm:$0xff]  }
 0x216   : > { %3773 = vmatpush1.bf16.msra.mxu0 %v6028_v41  ;;  %4117 = vmatpush1.bf16.msra.mxu1 %v6031_v42  ;;  %v6118_v41 = vld [vmem:[%s6620_s30 + $0xe40] ss:$16 sps:$4 sm:$0xff]   ;;  %v6121_v42 = vld [vmem:[%s6620_s30 + $0xe48] ss:$16 sps:$4 sm:$0xff]  }
 0x217   : > { %3774 = vmatprep.subr.bf16.mxu0 %v6036_v43  ;;  %4118 = vmatprep.subr.bf16.mxu1 %v6039_v44  ;;  %v6126_v43 = vld [vmem:[%s6620_s30 + $0xe64] ss:$16 sps:$4 sm:$0xff]   ;;  %v6129_v44 = vld [vmem:[%s6620_s30 + $0xe6c] ss:$16 sps:$4 sm:$0xff]  }
 0x21a   : > { %3775 = vmatpush1.bf16.msra.mxu0 %v6034_v45  ;;  %4119 = vmatpush1.bf16.msra.mxu1 %v6037_v46  ;;  %v6124_v45 = vld [vmem:[%s6620_s30 + $0xe60] ss:$16 sps:$4 sm:$0xff]   ;;  %v6127_v46 = vld [vmem:[%s6620_s30 + $0xe68] ss:$16 sps:$4 sm:$0xff]  }
 0x21b   : > { %3776 = vmatprep.subr.bf16.mxu0 %v6042_v47  ;;  %4120 = vmatprep.subr.bf16.mxu1 %v6045_v48  ;;  %v6132_v47 = vld [vmem:[%s6620_s30 + $0xe84] ss:$16 sps:$4 sm:$0xff]   ;;  %v6135_v48 = vld [vmem:[%s6620_s30 + $0xe8c] ss:$16 sps:$4 sm:$0xff]  }
 0x21e   : > { %3777 = vmatpush1.bf16.msra.mxu0 %v6040_v49  ;;  %4121 = vmatpush1.bf16.msra.mxu1 %v6043_v50  ;;  %v6130_v49 = vld [vmem:[%s6620_s30 + $0xe80] ss:$16 sps:$4 sm:$0xff]   ;;  %v6133_v50 = vld [vmem:[%s6620_s30 + $0xe88] ss:$16 sps:$4 sm:$0xff]  }
 0x21f   : > { %3778 = vmatprep.subr.bf16.mxu0 %v6048_v51  ;;  %4122 = vmatprep.subr.bf16.mxu1 %v6051_v52  ;;  %v6138_v51 = vld [vmem:[%s6620_s30 + $0xea4] ss:$16 sps:$4 sm:$0xff]   ;;  %v6141_v52 = vld [vmem:[%s6620_s30 + $0xeac] ss:$16 sps:$4 sm:$0xff]  }
 0x222   : > { %3779 = vmatpush1.bf16.msra.mxu0 %v6046_v53  ;;  %4123 = vmatpush1.bf16.msra.mxu1 %v6049_v54  ;;  %v6136_v53 = vld [vmem:[%s6620_s30 + $0xea0] ss:$16 sps:$4 sm:$0xff]   ;;  %v6139_v54 = vld [vmem:[%s6620_s30 + $0xea8] ss:$16 sps:$4 sm:$0xff]  }
 0x223   : > { %3780 = vmatprep.subr.bf16.mxu0 %v6054_v55  ;;  %4124 = vmatprep.subr.bf16.mxu1 %v6057_v56  ;;  %v6144_v55 = vld [vmem:[%s6620_s30 + $0xec4] ss:$16 sps:$4 sm:$0xff]   ;;  %v6147_v56 = vld [vmem:[%s6620_s30 + $0xecc] ss:$16 sps:$4 sm:$0xff]  }
 0x226   : > { %3781 = vmatpush1.bf16.msra.mxu0 %v6052_v57  ;;  %4125 = vmatpush1.bf16.msra.mxu1 %v6055_v58  ;;  %v6142_v57 = vld [vmem:[%s6620_s30 + $0xec0] ss:$16 sps:$4 sm:$0xff]   ;;  %v6145_v58 = vld [vmem:[%s6620_s30 + $0xec8] ss:$16 sps:$4 sm:$0xff]  }
 0x227   : > { %3782 = vmatprep.subr.bf16.mxu0 %v6060_v59  ;;  %4126 = vmatprep.subr.bf16.mxu1 %v6063_v60  ;;  %v6150_v59 = vld [vmem:[%s6620_s30 + $0xee4] ss:$16 sps:$4 sm:$0xff]   ;;  %v6153_v60 = vld [vmem:[%s6620_s30 + $0xeec] ss:$16 sps:$4 sm:$0xff]  }
 0x22a   : > { %3783 = vmatpush1.bf16.msra.mxu0 %v6058_v61  ;;  %4127 = vmatpush1.bf16.msra.mxu1 %v6061_v62  ;;  %v6148_v61 = vld [vmem:[%s6620_s30 + $0xee0] ss:$16 sps:$4 sm:$0xff]   ;;  %v6151_v62 = vld [vmem:[%s6620_s30 + $0xee8] ss:$16 sps:$4 sm:$0xff]  }
 0x22b   : > { %3784 = vmatprep.subr.bf16.mxu0 %v6066_v63  ;;  %4128 = vmatprep.subr.bf16.mxu1 %v6069_v0  ;;  %v6156_v63 = vld [vmem:[%s6620_s30 + $0xf04] ss:$16 sps:$4 sm:$0xff]   ;;  %v6159_v0 = vld [vmem:[%s6620_s30 + $0xf0c] ss:$16 sps:$4 sm:$0xff]  }
 0x22e   : > { %3785 = vmatpush1.bf16.msra.mxu0 %v6064_v1  ;;  %4129 = vmatpush1.bf16.msra.mxu1 %v6067_v2  ;;  %v6154_v1 = vld [vmem:[%s6620_s30 + $0xf00] ss:$16 sps:$4 sm:$0xff]   ;;  %v6157_v2 = vld [vmem:[%s6620_s30 + $0xf08] ss:$16 sps:$4 sm:$0xff]  }
 0x22f   : > { %3786 = vmatprep.subr.bf16.mxu0 %v6072_v3  ;;  %4130 = vmatprep.subr.bf16.mxu1 %v6075_v4  ;;  %v6162_v3 = vld [vmem:[%s6620_s30 + $0xf24] ss:$16 sps:$4 sm:$0xff]   ;;  %v6165_v4 = vld [vmem:[%s6620_s30 + $0xf2c] ss:$16 sps:$4 sm:$0xff]  }
 0x232   : > { %3787 = vmatpush1.bf16.msra.mxu0 %v6070_v5  ;;  %4131 = vmatpush1.bf16.msra.mxu1 %v6073_v6  ;;  %v6160_v5 = vld [vmem:[%s6620_s30 + $0xf20] ss:$16 sps:$4 sm:$0xff]   ;;  %v6163_v6 = vld [vmem:[%s6620_s30 + $0xf28] ss:$16 sps:$4 sm:$0xff]  }
 0x233   : > { %3788 = vmatprep.subr.bf16.mxu0 %v6078_v7  ;;  %4132 = vmatprep.subr.bf16.mxu1 %v6081_v8  ;;  %v6168_v7 = vld [vmem:[%s6620_s30 + $0xf44] ss:$16 sps:$4 sm:$0xff]   ;;  %v6171_v8 = vld [vmem:[%s6620_s30 + $0xf4c] ss:$16 sps:$4 sm:$0xff]  }
 0x236   : > { %3789 = vmatpush1.bf16.msra.mxu0 %v6076_v9  ;;  %4133 = vmatpush1.bf16.msra.mxu1 %v6079_v10  ;;  %v6166_v9 = vld [vmem:[%s6620_s30 + $0xf40] ss:$16 sps:$4 sm:$0xff]   ;;  %v6169_v10 = vld [vmem:[%s6620_s30 + $0xf48] ss:$16 sps:$4 sm:$0xff]  }
 0x237   : > { %3790 = vmatprep.subr.bf16.mxu0 %v6084_v11  ;;  %4134 = vmatprep.subr.bf16.mxu1 %v6087_v12  ;;  %v6174_v11 = vld [vmem:[%s6620_s30 + $0xf64] ss:$16 sps:$4 sm:$0xff]   ;;  %v6177_v12 = vld [vmem:[%s6620_s30 + $0xf6c] ss:$16 sps:$4 sm:$0xff]  }
 0x23a   : > { %3791 = vmatpush1.bf16.msra.mxu0 %v6082_v13  ;;  %4135 = vmatpush1.bf16.msra.mxu1 %v6085_v16  ;;  %v6172_v13 = vld [vmem:[%s6620_s30 + $0xf60] ss:$16 sps:$4 sm:$0xff]   ;;  %v6175_v16 = vld [vmem:[%s6620_s30 + $0xf68] ss:$16 sps:$4 sm:$0xff]  }
 0x23b   : > { %3792 = vmatprep.subr.bf16.mxu0 %v6090_v17  ;;  %4136 = vmatprep.subr.bf16.mxu1 %v6093_v20  ;;  %v6180_v17 = vld [vmem:[%s6620_s30 + $0xf84] ss:$16 sps:$4 sm:$0xff]   ;;  %v6183_v20 = vld [vmem:[%s6620_s30 + $0xf8c] ss:$16 sps:$4 sm:$0xff]  }
 0x23e   : > { %3793 = vmatpush1.bf16.msra.mxu0 %v6088_v22  ;;  %4137 = vmatpush1.bf16.msra.mxu1 %v6091_v15  ;;  %v6178_v22 = vld [vmem:[%s6620_s30 + $0xf80] ss:$16 sps:$4 sm:$0xff]   ;;  %v6181_v15 = vld [vmem:[%s6620_s30 + $0xf88] ss:$16 sps:$4 sm:$0xff]  }
 0x23f   : > { %3794 = vmatprep.subr.bf16.mxu0 %v6096_v23  ;;  %4138 = vmatprep.subr.bf16.mxu1 %v6099_v24  ;;  %v6186_v23 = vld [vmem:[%s6620_s30 + $0xfa4] ss:$16 sps:$4 sm:$0xff]   ;;  %v6189_v24 = vld [vmem:[%s6620_s30 + $0xfac] ss:$16 sps:$4 sm:$0xff]  }
 0x242   : > { %3795 = vmatpush1.bf16.msra.mxu0 %v6094_v18  ;;  %4139 = vmatpush1.bf16.msra.mxu1 %v6097_v19  ;;  %v6184_v18 = vld [vmem:[%s6620_s30 + $0xfa0] ss:$16 sps:$4 sm:$0xff]   ;;  %v6187_v19 = vld [vmem:[%s6620_s30 + $0xfa8] ss:$16 sps:$4 sm:$0xff]  }
 0x243   : > { %3796 = vmatprep.subr.bf16.mxu0 %v6102_v27  ;;  %4140 = vmatprep.subr.bf16.mxu1 %v6105_v28  ;;  %v6192_v27 = vld [vmem:[%s6620_s30 + $0xfc4] ss:$16 sps:$4 sm:$0xff]   ;;  %v6195_v28 = vld [vmem:[%s6620_s30 + $0xfcc] ss:$16 sps:$4 sm:$0xff]  }
 0x246   : > { %3797 = vmatpush1.bf16.msra.mxu0 %v6100_v29  ;;  %4141 = vmatpush1.bf16.msra.mxu1 %v6103_v14  ;;  %v6190_v29 = vld [vmem:[%s6620_s30 + $0xfc0] ss:$16 sps:$4 sm:$0xff]   ;;  %v6193_v14 = vld [vmem:[%s6620_s30 + $0xfc8] ss:$16 sps:$4 sm:$0xff]  }
 0x247   : > { %3809 = vmatprep.subr.bf16.mxu0 %v6108_v31  ;;  %4153 = vmatprep.subr.bf16.mxu1 %v6111_v32  ;;  %v6198_v31 = vld [vmem:[%s6620_s30 + $0xfe4] ss:$16 sps:$4 sm:$0xff]   ;;  %v6201_v32 = vld [vmem:[%s6620_s30 + $0xfec] ss:$16 sps:$4 sm:$0xff]  }
 0x249   : > { %3799 = vmatmul.mubr.bf16.vlgmr.msra.gmra.mrb[0].mxu0 %v4700_v33  ;;  %4143 = vmatmul.mubr.bf16.vlgmr.msra.gmra.mrb[0].mxu1 %v4700_v33  ;;  %v6196_v33 = vld [vmem:[%s6620_s30 + $0xfe0] ss:$16 sps:$4 sm:$0xff]  }
 0x24a   : > { %3810 = vmatpush1.bf16.msra.mxu0 %v6106_v26  ;;  %4154 = vmatpush1.bf16.msra.mxu1 %v6109_v35  ;;  %v6199_v26 = vld [vmem:[%s6620_s30 + $0xfe8] ss:$16 sps:$4 sm:$0xff]   ;;  %v6202_v35 = vld [vmem:[%s7081_s18 + $0x40] sm:$0xff]  }
 0x24b   : > { %3811 = vmatprep.subr.bf16.mxu0 %v6114_v36  ;;  %4155 = vmatprep.subr.bf16.mxu1 %v6117_v37  ;;  %v6203_v36 = vld [vmem:[%s7081_s18 + $0xc0] sm:$0xff]   ;;  %v4702_v37 = vcombine.low %v7137_v34, %v7139_v25  ;;  %v6209_v34 = vld [vmem:[%s7081_s18 + $0x88] sm:$0xff]   ;;  %v6210_v25 = vld [vmem:[%s7081_s18 + $0x50] sm:$0xff]  }
 0x24c   : > { %3841 = vmatprep.mubr.bf16.mxu0 %v4703_v30  ;;  %4185 = vmatprep.mubr.bf16.mxu1 %v4703_v30  ;;  %v6204_v30 = vld [vmem:[%s7081_s18] sm:$0xff]  }
 0x24e   : > { %3812 = vmatpush1.bf16.msra.mxu0 %v6112_v21  ;;  %4156 = vmatpush1.bf16.msra.mxu1 %v6115_v38  ;;  %v6205_v21 = vld [vmem:[%s7081_s18 + $0x80] sm:$0xff]   ;;  %v6206_v38 = vld [vmem:[%s7081_s18 + $0x48] sm:$0xff]  }
 0x24f   : > { %3813 = vmatprep.subr.bf16.mxu0 %v6120_v39  ;;  %4157 = vmatprep.subr.bf16.mxu1 %v6123_v40  ;;  %v6207_v39 = vld [vmem:[%s7081_s18 + $0xc8] sm:$0xff]  }
 0x250   : > { %v6208_v40 = vld [vmem:[%s7081_s18 + $0x8] sm:$0xff]  }
 0x252   : > { %3814 = vmatpush1.bf16.msra.mxu0 %v6118_v41  ;;  %4158 = vmatpush1.bf16.msra.mxu1 %v6121_v42  ;;  %v6211_v41 = vld [vmem:[%s7081_s18 + $0xd0] sm:$0xff]  }
 0x253   : > { %3815 = vmatprep.subr.bf16.mxu0 %v6126_v43  ;;  %4159 = vmatprep.subr.bf16.mxu1 %v6129_v44  ;;  %v6212_v42 = vld [vmem:[%s7081_s18 + $0x10] sm:$0xff]   ;;  %v6214_v44 = vld [vmem:[%s7081_s18 + $0x58] sm:$0xff]  }
 0x254   : > { %v6213_v43 = vld [vmem:[%s7081_s18 + $0x90] sm:$0xff]  }
 0x256   : > { %3816 = vmatpush1.bf16.msra.mxu0 %v6124_v45  ;;  %4160 = vmatpush1.bf16.msra.mxu1 %v6127_v46  ;;  %v6215_v45 = vld [vmem:[%s7081_s18 + $0xd8] sm:$0xff]  }
 0x257   : > { %3817 = vmatprep.subr.bf16.mxu0 %v6132_v47  ;;  %4161 = vmatprep.subr.bf16.mxu1 %v6135_v48  ;;  %v6216_v46 = vld [vmem:[%s7081_s18 + $0x18] sm:$0xff]   ;;  %v6218_v48 = vld [vmem:[%s7081_s18 + $0x60] sm:$0xff]  }
 0x258   : > { %v6217_v47 = vld [vmem:[%s7081_s18 + $0x98] sm:$0xff]  }
 0x25a   : > { %3818 = vmatpush1.bf16.msra.mxu0 %v6130_v49  ;;  %4162 = vmatpush1.bf16.msra.mxu1 %v6133_v50  ;;  %v6219_v49 = vld [vmem:[%s7081_s18 + $0xe0] sm:$0xff]  }
 0x25b   : > { %3819 = vmatprep.subr.bf16.mxu0 %v6138_v51  ;;  %4163 = vmatprep.subr.bf16.mxu1 %v6141_v52  ;;  %v6220_v50 = vld [vmem:[%s7081_s18 + $0x20] sm:$0xff]   ;;  %v6222_v52 = vld [vmem:[%s7081_s18 + $0x68] sm:$0xff]  }
 0x25c   : > { %v6221_v51 = vld [vmem:[%s7081_s18 + $0xa0] sm:$0xff]  }
 0x25e   : > { %3820 = vmatpush1.bf16.msra.mxu0 %v6136_v53  ;;  %4164 = vmatpush1.bf16.msra.mxu1 %v6139_v54  ;;  %v6223_v53 = vld [vmem:[%s7081_s18 + $0xe8] sm:$0xff]  }
 0x25f   : > { %3821 = vmatprep.subr.bf16.mxu0 %v6144_v55  ;;  %4165 = vmatprep.subr.bf16.mxu1 %v6147_v56  ;;  %v6224_v54 = vld [vmem:[%s7081_s18 + $0x28] sm:$0xff]   ;;  %v6226_v56 = vld [vmem:[%s7081_s18 + $0x70] sm:$0xff]  }
 0x260   : > { %v6225_v55 = vld [vmem:[%s7081_s18 + $0xa8] sm:$0xff]  }
 0x262   : > { %3822 = vmatpush1.bf16.msra.mxu0 %v6142_v57  ;;  %4166 = vmatpush1.bf16.msra.mxu1 %v6145_v58  ;;  %v6227_v57 = vld [vmem:[%s7081_s18 + $0xf0] sm:$0xff]  }
 0x263   : > { %3823 = vmatprep.subr.bf16.mxu0 %v6150_v59  ;;  %4167 = vmatprep.subr.bf16.mxu1 %v6153_v60  ;;  %v6228_v58 = vld [vmem:[%s7081_s18 + $0x30] sm:$0xff]   ;;  %v6230_v60 = vld [vmem:[%s7081_s18 + $0x78] sm:$0xff]  }
 0x264   : > { %v6229_v59 = vld [vmem:[%s7081_s18 + $0xb0] sm:$0xff]  }
 0x266   : > { %3824 = vmatpush1.bf16.msra.mxu0 %v6148_v61  ;;  %4168 = vmatpush1.bf16.msra.mxu1 %v6151_v62  ;;  %v6231_v61 = vld [vmem:[%s7081_s18 + $0xf8] sm:$0xff]  }
 0x267   : > { %3825 = vmatprep.subr.bf16.mxu0 %v6156_v63  ;;  %4169 = vmatprep.subr.bf16.mxu1 %v6159_v0  ;;  %v6232_v62 = vld [vmem:[%s7081_s18 + $0x38] sm:$0xff]   ;;  %v848_v0 = vlaneseq }
 0x268   : > { %v6233_v63 = vld [vmem:[%s7081_s18 + $0xb8] sm:$0xff]  }
 0x26a   : > { %3826 = vmatpush1.bf16.msra.mxu0 %v6154_v1  ;;  %4170 = vmatpush1.bf16.msra.mxu1 %v6157_v2  ;;  %v849_v1 = vshrl.u32 %v848_v0, 7 }
 0x26b   : > { %3827 = vmatprep.subr.bf16.mxu0 %v6162_v3  ;;  %4171 = vmatprep.subr.bf16.mxu1 %v6165_v4  ;;  %v846_v4 = vld [vmem:[%s273_s11] sm:$0xf] }
 0x26c   : > { %v850_v2 = vsub.s32 0, %v849_v1  ;;  %v858_v3 = vsub.s32 2, %v849_v1 }
 0x26e   : > { %3828 = vmatpush1.bf16.msra.mxu0 %v6160_v5  ;;  %4172 = vmatpush1.bf16.msra.mxu1 %v6163_v6  ;;  %v854_v5 = vsub.s32 1, %v849_v1  ;;  %v862_v6 = vsub.s32 3, %v849_v1 }
 0x26f   : > { %3829 = vmatprep.subr.bf16.mxu0 %v6168_v7  ;;  %4173 = vmatprep.subr.bf16.mxu1 %v6171_v8  ;;  %v851_v7 = vrot.slane %v846_v4, %v850_v2  ;;  %v859_v8 = vrot.slane %v846_v4, %v858_v3 }
 0x272   : > { %3830 = vmatpush1.bf16.msra.mxu0 %v6166_v9  ;;  %4174 = vmatpush1.bf16.msra.mxu1 %v6169_v10  ;;  %v855_v9 = vrot.slane %v846_v4, %v854_v5  ;;  %v863_v10 = vrot.slane %v846_v4, %v862_v6 }
 0x273   : > { %3831 = vmatprep.subr.bf16.mxu0 %v6174_v11  ;;  %4175 = vmatprep.subr.bf16.mxu1 %v6177_v12 }
 0x276   : > { %3832 = vmatpush1.bf16.msra.mxu0 %v6172_v13  ;;  %4176 = vmatpush1.bf16.msra.mxu1 %v6175_v16 }
 0x277   : > { %3833 = vmatprep.subr.bf16.mxu0 %v6180_v17  ;;  %4177 = vmatprep.subr.bf16.mxu1 %v6183_v20 }
 0x27a   : > { %3834 = vmatpush1.bf16.msra.mxu0 %v6178_v22  ;;  %4178 = vmatpush1.bf16.msra.mxu1 %v6181_v15 }
 0x27b   : > { %3835 = vmatprep.subr.bf16.mxu0 %v6186_v23  ;;  %4179 = vmatprep.subr.bf16.mxu1 %v6189_v24 }
 0x27e   : > { %3836 = vmatpush1.bf16.msra.mxu0 %v6184_v18  ;;  %4180 = vmatpush1.bf16.msra.mxu1 %v6187_v19 }
 0x27f   : > { %3837 = vmatprep.subr.bf16.mxu0 %v6192_v27  ;;  %4181 = vmatprep.subr.bf16.mxu1 %v6195_v28 }
 0x282   : > { %3838 = vmatpush1.bf16.msra.mxu0 %v6190_v29  ;;  %4182 = vmatpush1.bf16.msra.mxu1 %v6193_v14 }
 0x283   : > { %3839 = vmatprep.subr.bf16.mxu0 %v6198_v31  ;;  %4183 = vmatprep.subr.bf16.mxu1 %v6201_v32 }
 0x286   : > { %3840 = vmatpush1.bf16.msra.mxu0 %v6196_v33  ;;  %4184 = vmatpush1.bf16.msra.mxu1 %v6199_v26 }
 0x287   : > { %5255 = vmatprep.subr.bf16.mxu0 %v6202_v35  ;;  %5277 = vmatprep.subr.bf16.mxu1 %v6203_v36 }
 0x289   : > { %3842 = vmatmul.mubr.bf16.vlgmr.msra.gmra.mrb[0].mxu0 %v4702_v37  ;;  %4186 = vmatmul.mubr.bf16.vlgmr.msra.gmra.mrb[0].mxu1 %v4702_v37 }
 0x28a   : > { %5256 = vmatpush3.bf16.msra.mxu0 %v6204_v30  ;;  %5278 = vmatpush3.bf16.msra.mxu1 %v6205_v21 }
 0x28b   : > { %5257 = vmatprep.subr.bf16.mxu0 %v6206_v38  ;;  %5279 = vmatprep.subr.bf16.mxu1 %v6207_v39 }
 0x28e   : > { %5258 = vmatpush3.bf16.msra.mxu0 %v6208_v40  ;;  %5280 = vmatpush3.bf16.msra.mxu1 %v6209_v34 }
 0x28f   : > { %5259 = vmatprep.subr.bf16.mxu0 %v6210_v25  ;;  %5281 = vmatprep.subr.bf16.mxu1 %v6211_v41 }
 0x292   : > { %5260 = vmatpush3.bf16.msra.mxu0 %v6212_v42  ;;  %5282 = vmatpush3.bf16.msra.mxu1 %v6213_v43 }
 0x293   : > { %5261 = vmatprep.subr.bf16.mxu0 %v6214_v44  ;;  %5283 = vmatprep.subr.bf16.mxu1 %v6215_v45 }
 0x296   : > { %5262 = vmatpush3.bf16.msra.mxu0 %v6216_v46  ;;  %5284 = vmatpush3.bf16.msra.mxu1 %v6217_v47 }
 0x297   : > { %5263 = vmatprep.subr.bf16.mxu0 %v6218_v48  ;;  %5285 = vmatprep.subr.bf16.mxu1 %v6219_v49 }
 0x29a   : > { %5264 = vmatpush3.bf16.msra.mxu0 %v6220_v50  ;;  %5286 = vmatpush3.bf16.msra.mxu1 %v6221_v51 }
 0x29b   : > { %5265 = vmatprep.subr.bf16.mxu0 %v6222_v52  ;;  %5287 = vmatprep.subr.bf16.mxu1 %v6223_v53  ;;  %v6403_v53 = vmov (!%p7312_p0), 0.0  }
 0x29c   : > { %4551 = vst.msk [vmem:[%s7292_s5] sm:$0xff] (!%p7312_p0), %vm4550_vm0, %v6403_v53  ;;  %4552 = vst.msk [vmem:[%s7292_s5 + $0x8] sm:$0xff] (!%p7312_p0), %vm4550_vm0, %v6403_v53 }
 0x29e   : > { %5266 = vmatpush3.bf16.msra.mxu0 %v6224_v54  ;;  %5288 = vmatpush3.bf16.msra.mxu1 %v6225_v55 }
 0x29f   : > { %5267 = vmatprep.subr.bf16.mxu0 %v6226_v56  ;;  %5289 = vmatprep.subr.bf16.mxu1 %v6227_v57 }
 0x2a2   : > { %5268 = vmatpush3.bf16.msra.mxu0 %v6228_v58  ;;  %5290 = vmatpush3.bf16.msra.mxu1 %v6229_v59 }
 0x2a3   : > { %5269 = vmatprep.subr.bf16.mxu0 %v6230_v60  ;;  %5291 = vmatprep.subr.bf16.mxu1 %v6231_v61 }
 0x2a6   : > { %5270 = vmatpush3.bf16.msra.mxu0 %v6232_v62  ;;  %5292 = vmatpush3.bf16.msra.mxu1 %v6233_v63 }
 0x35c   : > { %v3843_v11 = vpop.f32.mrb[0].mxu0  ;;  %v4187_v12 = vpop.f32.mrb[0].mxu1 }
 0x35d   : > { %v5299_v13 = vadd.f32 %v3843_v11, %v851_v7  ;;  %v5303_v16 = vadd.f32 %v4187_v12, %v859_v8  ;;  %v3845_v17 = vpop.f32.mrb[1].mxu0  ;;  %v4189_v20 = vpop.f32.mrb[1].mxu1 }
 0x35e   : > { %v5300_v22 = vadd.f32 %v3845_v17, %v855_v9  ;;  %v5304_v15 = vadd.f32 %v4189_v20, %v863_v10  ;;  %v3847_v23 = vpop.f32.mrb[2].mxu0  ;;  %v4191_v24 = vpop.f32.mrb[2].mxu1 }
 0x35f   : > { %v5301_v18 = vadd.f32 %v3847_v23, %v851_v7  ;;  %v5305_v19 = vadd.f32 %v4191_v24, %v859_v8  ;;  %v3849_v27 = vpop.f32.mrb[3].mxu0  ;;  %v4193_v28 = vpop.f32.mrb[3].mxu1  ;;  %v4196_v31 = vmax.f32 %v5299_v13, 0.0  ;;  %v4198_v32 = vmax.f32 %v5303_v16, 0.0 }
 0x360   : > { %v5302_v29 = vadd.f32 %v3849_v27, %v855_v9  ;;  %v5306_v14 = vadd.f32 %v4193_v28, %v863_v10  ;;  %v4197_v35 = vmax.f32 %v5300_v22, 0.0  ;;  %v4199_v36 = vmax.f32 %v5304_v15, 0.0 }
 0x361   : > { %v4200_v33 = vmax.f32 %v5301_v18, 0.0  ;;  %v4202_v26 = vmax.f32 %v5305_v19, 0.0 }
 0x362   : > { %v4201_v37 = vmax.f32 %v5302_v29, 0.0  ;;  %v4203_v30 = vmax.f32 %v5306_v14, 0.0 }
 0x363   : > { %v4204_v21 = vpack.c.bf16 %v4200_v33, %v4196_v31  ;;  %v4206_v38 = vpack.c.bf16 %v4202_v26, %v4198_v32 }
 0x364   : > { %v4205_v39 = vpack.c.bf16 %v4201_v37, %v4197_v35  ;;  %v4207_v40 = vpack.c.bf16 %v4203_v30, %v4199_v36 }
 0x366   : > { %4496 = vmatprep.mubr.bf16.mxu0 %v4205_v39  ;;  %4537 = vmatprep.mubr.bf16.mxu1 %v4207_v40 }
 0x367   : > { %4497 = vmatmul.mubr.bf16.vlgmr.msra.gmra.mrb[4].mxu0 %v4204_v21  ;;  %4538 = vmatmul.mubr.bf16.vlgmr.msra.gmra.mrb[4].mxu1 %v4206_v38 }
 0x43a   : > { %v5271_v34 = vpop.f32.mrb[4].mxu0  ;;  %v5293_v25 = vpop.f32.mrb[4].mxu1  ;;  %4549 = sbr.rel (%p7312_p0) target bundleno = 1089 (0x441), region = 60 }
 0x43b   : > { %v5272_v41 = vpop.f32.mrb[5].mxu0  ;;  %v5294_v42 = vpop.f32.mrb[5].mxu1 }
 0x43c   : > { %v5273_v43 = vadd.f32 %v5272_v41, %v5271_v34  ;;  %v5295_v44 = vadd.f32 %v5294_v42, %v5293_v25  ;;  %v5274_v45 = vpop.f32.mrb[6].mxu0  ;;  %v5296_v46 = vpop.f32.mrb[6].mxu1 }
 0x43d   : > { %v5275_v47 = vpop.f32.mrb[7].mxu0  ;;  %v5297_v48 = vpop.f32.mrb[7].mxu1 }
 0x43e   : > { %v4540_v49 = vadd.f32 %v5295_v44, %v5273_v43  ;;  %v5276_v50 = vadd.f32 %v5275_v47, %v5274_v45  ;;  %v5298_v51 = vadd.f32 %v5297_v48, %v5296_v46 }
 0x440   : > { %v4543_v52 = vadd.f32 %v5298_v51, %v5276_v50 }
 0x441 PF: > { %v4553_v54 = vld [vmem:[%s7292_s5] sm:$0xff]  ;;  %vm4557_vm1 = vcmask 31744   ;;  %v4554_v55 = vld [vmem:[%s7292_s5 + $0x8] sm:$0xff]  ;;  %p5249_p4 = scmp.ne.s32.totalorder %s6512_s8, 1 }
 0x442   : > { %v4555_v56 = vadd.f32 %v4553_v54, %v4540_v49  ;;  %v4556_v57 = vadd.f32 %v4554_v55, %v4543_v52  ;;  %v5250_v59 = vld [vmem:[#allocation7] ss:$0 sm:$0xff] (!%p5249_p4) }
 0x443   : > { %4563 = sbr.rel (%p5249_p4) target bundleno = 1103 (0x44f), region = 64 }
 0x444   : > { %4558 = vst.msk [vmem:[%s7292_s5] sm:$0xff] %vm4557_vm1, %v4555_v56  ;;  %4559 = vst.msk [vmem:[%s7292_s5 + $0x8] sm:$0xff] %vm4557_vm1, %v4556_v57 }
 0x44b   : > { %v4564_v58 = vld [vmem:[%s7292_s5] sm:$0xff]  ;;  %v4565_v60 = vld [vmem:[%s7292_s5 + $0x8] sm:$0xff] }
 0x44c   : > { %v4573_v61 = vadd.f32 %v5250_v59, %v4564_v58  ;;  %v4574_v62 = vadd.f32 %v5250_v59, %v4565_v60 }
 0x44e   : > { %4575 = vst.msk [vmem:[%s7292_s5] sm:$0xff] %vm4557_vm1, %v4573_v61  ;;  %4576 = vst.msk [vmem:[%s7292_s5 + $0x8] sm:$0xff] %vm4557_vm1, %v4574_v62 }
 0x44f PF: > { %p17_p10 = scmp.ge.s32.totalorder %s6455_s22, 4   ;;  %s7313_s18 = smov %s6384_s19 }
 0x450   : > { %s7314_s19 = smov %s6388_s20  ;;  %s7315_s20 = smov %s6465_s25 }
 0x451   : > { %s7316_s21 = smov %s6455_s22  ;;  %19 = sbr.rel (!%p17_p10) target bundleno = 5 (0x5), region = 107 }
 0x458   :  { %4588 = vsyncpa [#allocation3], 1 }
 0x459   :  { %4590 = vsyncpa [#allocation3 + $0x1], 1 }
 0x45a   :  { %4591 = vsyncpa [#allocation5], 1 }
 0x45b   :  { %4593 = vsyncpa [#allocation5 + $0x1], 1 }
 0x45c   :  { %4594 = vsyncpa [#allocation8], 1 }

</bundles_post_ra>
